<compile_context>
chip_gen: v6e
topology: v6e:2x2x1
jax: 0.10.0
libtpu: 0.0.40
codegen_flags: <defaults>
</compile_context>

<pallas_src>
import functools

import numpy as np
import jax
import jax.numpy as jnp
from jax.experimental import pallas as pl
from jax.experimental.pallas import tpu as pltpu


# --------------------------------------------------------------------------
# fused encoder (conv3x3+ReLU x2) + global-average-pool kernel
# --------------------------------------------------------------------------
def _encoder_gap_kernel(x_ref, w1_ref, b1_ref, w2_ref, b2_ref, o_ref, h1_ref,
                        *, h, w, c1, c2):
    """Fused conv1 -> ReLU -> conv2 -> ReLU -> GAP for a block of bb images.

    x_ref  : (bb, H+2, W*Cin)  bf16  H-padded images, channels interleaved in lanes
    w1_ref : (3, W*Cin, W*C1)  bf16  conv1 band weights (kw + zero padding folded in)
    b1_ref : (1, W*C1)         f32
    w2_ref : (3, W*C1, W*C2)   bf16  conv2 band weights
    b2_ref : (1, W*C2)         f32
    o_ref  : (bb, C2)          f32   pooled features
    h1_ref : (bb, H+2, W*C1)   bf16  VMEM scratch: H-padded conv1 activation
    """
    bb = x_ref.shape[0]
    wcin = x_ref.shape[2]
    m = bb * h

    # ---- conv1: one matmul per kernel row, bf16 taps straight from the ref ----
    acc1 = jnp.zeros((m, w * c1), jnp.float32)
    for kh in range(3):
        tap = x_ref[:, kh:kh + h, :].reshape(m, wcin)          # (bb*H, W*Cin) bf16
        acc1 += jnp.dot(tap, w1_ref[kh], preferred_element_type=jnp.float32)
    y1 = jnp.maximum(acc1 + b1_ref[...], 0.0)                  # (bb*H, W*C1) f32

    # ---- re-pad rows in VMEM (bf16).  Interior is fully overwritten each step;
    # only the two pad rows need zeros, so this is the whole scratch traffic. ----
    zrow = jnp.zeros((bb, 1, w * c1), jnp.bfloat16)
    h1_ref[:, 0:1, :] = zrow
    h1_ref[:, h + 1:h + 2, :] = zrow
    h1_ref[:, 1:1 + h, :] = y1.astype(jnp.bfloat16).reshape(bb, h, w * c1)

    # ---- conv2: one matmul per kernel row from the bf16 scratch ----
    acc2 = jnp.zeros((m, w * c2), jnp.float32)
    for kh in range(3):
        tap = h1_ref[:, kh:kh + h, :].reshape(m, w * c1)       # (bb*H, W*C1) bf16
        acc2 += jnp.dot(tap, w2_ref[kh], preferred_element_type=jnp.float32)
    y2 = jnp.maximum(acc2 + b2_ref[...], 0.0)                  # (bb*H, W*C2) f32

    # ---- AdaptiveAvgPool2d(1) + flatten: mean over the H*W positions (f32) ----
    s = y2.reshape(bb, h, w * c2).sum(axis=1)                  # (bb, W*C2)
    o_ref[...] = s.reshape(bb, w, c2).sum(axis=1) * (1.0 / (h * w))


# --------------------------------------------------------------------------
# host-side helpers
# --------------------------------------------------------------------------
def _band_weights(w9, width):
    """(9, Cin, Cout) conv weights -> (3, width*Cin, width*Cout) band matrices.

    band[kh][p*Cin+ci, j*Cout+co] = w[kh, p-j+1, ci, co] if |p-j| <= 1 else 0,
    so a 'same' 3x3 conv row becomes a single matmul; the implicit zeros at the
    left/right image border live in the band matrix (no column padding needed).
    """
    cin, cout = w9.shape[1], w9.shape[2]
    wk = w9.reshape(3, 3, cin, cout)
    p = jnp.arange(width)[:, None]                  # input column
    j = jnp.arange(width)[None, :]                  # output column
    kw = p - j + 1                                  # kernel column hit by (p -> j)
    valid = (kw >= 0) & (kw <= 2)
    band = wk[:, jnp.clip(kw, 0, 2)]                # (3, width, width, cin, cout)
    band = jnp.where(valid[None, :, :, None, None], band, 0.0)
    band = band.transpose(0, 1, 3, 2, 4).reshape(3, width * cin, width * cout)
    return band


def _pick_batch_block(b, max_bb=8):
    """Largest divisor of b that is <= max_bb, preferring >= 2 grid steps so the
    v7x megacore / software pipeline has something to split."""
    divisors = [d for d in range(1, min(b, max_bb) + 1) if b % d == 0]
    with_steps = [d for d in divisors if b // d >= 2]
    return max(with_steps) if with_steps else max(divisors)


def init_params(key, cin=3, c1=16, c2=32):
    # Conv weights stored as (kh*3+kw, Cin, Cout).  A PyTorch tensor of shape
    # (Cout, Cin, kh, kw) maps via w.transpose(2, 3, 1, 0).reshape(9, Cin, Cout).
    k1, k2, k3, k4 = jax.random.split(key, 4)
    return {
        "w1": jax.random.normal(k1, (9, cin, c1), jnp.float32) * 0.1,
        "b1": jax.random.normal(k2, (c1,), jnp.float32) * 0.01,
        "w2": jax.random.normal(k3, (9, c1, c2), jnp.float32) * 0.1,
        "b2": jax.random.normal(k4, (c2,), jnp.float32) * 0.01,
    }


def level_model_forward(params, x_nchw, *, block_b=None):
    x = jnp.transpose(x_nchw, (0, 2, 3, 1)).astype(jnp.float32)   # NCHW -> NHWC
    b, h, w, cin = x.shape
    hp = h + 2
    c1 = params["w1"].shape[-1]
    c2 = params["w2"].shape[-1]

    bb = _pick_batch_block(b) if block_b is None else block_b
    nsteps = b // bb

    # Pad the H dimension only (column padding is folded into the band weights),
    # interleave channels into lanes: (B, H+2, W*Cin), bf16 at the kernel boundary.
    xp = jnp.pad(x, ((0, 0), (1, 1), (0, 0), (0, 0)))
    xp = xp.reshape(nsteps, bb, hp, w * cin).astype(jnp.bfloat16)

    band1 = _band_weights(params["w1"], w).astype(jnp.bfloat16)   # (3, W*Cin, W*C1)
    band2 = _band_weights(params["w2"], w).astype(jnp.bfloat16)   # (3, W*C1, W*C2)
    b1t = jnp.tile(params["b1"], w).reshape(1, w * c1).astype(jnp.float32)
    b2t = jnp.tile(params["b2"], w).reshape(1, w * c2).astype(jnp.float32)

    kernel = functools.partial(_encoder_gap_kernel, h=h, w=w, c1=c1, c2=c2)
    feats = pl.pallas_call(
        kernel,
        out_shape=jax.ShapeDtypeStruct((nsteps, bb, c2), jnp.float32),
        grid=(nsteps,),
        in_specs=[
            pl.BlockSpec((None, bb, hp, w * cin), lambda i: (i, 0, 0, 0)),  # images
            pl.BlockSpec((3, w * cin, w * c1), lambda i: (0, 0, 0)),        # conv1 band
            pl.BlockSpec((1, w * c1), lambda i: (0, 0)),                    # conv1 bias
            pl.BlockSpec((3, w * c1, w * c2), lambda i: (0, 0, 0)),         # conv2 band
            pl.BlockSpec((1, w * c2), lambda i: (0, 0)),                    # conv2 bias
        ],
        out_specs=pl.BlockSpec((None, bb, c2), lambda i: (i, 0, 0)),
        scratch_shapes=[pltpu.VMEM((bb, hp, w * c1), jnp.bfloat16)],
        compiler_params=pltpu.CompilerParams(
            # batch blocks sharded across TensorCores on v7x; total VMEM use here
            # is ~2 MiB so the default scoped limit is fine on all generations.
            dimension_semantics=("parallel",),
        ),
    )(xp, band1, b1t, band2, b2t)
    return feats.reshape(b, c2)           # (B, in_features)


# --------------------------------------------------------------------------
# pure-JAX reference (f32) for a parity check
# --------------------------------------------------------------------------
def _reference_forward(params, x_nchw):
    x = jnp.transpose(x_nchw, (0, 2, 3, 1)).astype(jnp.float32)
    dn = ("NHWC", "HWIO", "NHWC")
    w1 = params["w1"].reshape(3, 3, -1, params["w1"].shape[-1])
    w2 = params["w2"].reshape(3, 3, -1, params["w2"].shape[-1])
    y = jax.lax.conv_general_dilated(x, w1, (1, 1), "SAME", dimension_numbers=dn,
                                     precision=jax.lax.Precision.HIGHEST)
    y = jax.nn.relu(y + params["b1"])
    y = jax.lax.conv_general_dilated(y, w2, (1, 1), "SAME", dimension_numbers=dn,
                                     precision=jax.lax.Precision.HIGHEST)
    y = jax.nn.relu(y + params["b2"])
    return y.mean(axis=(1, 2))


if __name__ == "__main__":
    key = jax.random.PRNGKey(0)
    pkey, xkey = jax.random.split(key)
    params = init_params(pkey, cin=3, c1=16, c2=32)

    # small NCHW input consistent with an image model: (B=2, C=3, H=16, W=16)
    x = jax.random.normal(xkey, (2, 3, 16, 16), jnp.float32)

    out = jax.jit(level_model_forward)(params, x)
    out = jax.block_until_ready(out)
    assert out.shape == (2, 32), out.shape

    ref = jax.block_until_ready(_reference_forward(params, x))
    np.testing.assert_allclose(np.asarray(out), np.asarray(ref), rtol=5e-2, atol=2e-2)

    print("KERNEL_OK")
</pallas_src>

<mosaic_0001>
module attributes {stable_mosaic.version = 11 : i64} {
  func.func @_encoder_gap_kernel(%arg0: i32, %arg1: memref<1x1x18x48xbf16, #tpu.memory_space<vmem>>, %arg2: memref<3x48x256xbf16, #tpu.memory_space<vmem>>, %arg3: memref<1x256xf32, #tpu.memory_space<vmem>>, %arg4: memref<3x256x512xbf16, #tpu.memory_space<vmem>>, %arg5: memref<1x512xf32, #tpu.memory_space<vmem>>, %arg6: memref<1x1x32xf32, #tpu.memory_space<vmem>>, %arg7: memref<1x18x256xbf16, #tpu.memory_space<vmem>>) attributes {dimension_semantics = [#tpu.dimension_semantics<parallel>], iteration_bounds = array<i64: 2>, scalar_prefetch = 0 : i64, scratch_operands = 1 : i64, tpu.core_type = #tpu.core_type<tc>, window_params = [{transform_indices = @transform_0, window_bounds = array<i64: 1, 1, 18, 48>}, {pipeline_mode = #tpu.pipeline_mode<synchronous>, transform_indices = @transform_1, window_bounds = array<i64: 3, 48, 256>}, {pipeline_mode = #tpu.pipeline_mode<synchronous>, transform_indices = @transform_2, window_bounds = array<i64: 1, 256>}, {pipeline_mode = #tpu.pipeline_mode<synchronous>, transform_indices = @transform_3, window_bounds = array<i64: 3, 256, 512>}, {pipeline_mode = #tpu.pipeline_mode<synchronous>, transform_indices = @transform_4, window_bounds = array<i64: 1, 512>}, {transform_indices = @transform_5, window_bounds = array<i64: 1, 1, 32>}]} {
    %cst = arith.constant 0.000000e+00 : f32
    %0 = vector.broadcast %cst : f32 to vector<16x256xf32>
    %c0 = arith.constant 0 : index
    %c0_0 = arith.constant 0 : index
    %c0_1 = arith.constant 0 : index
    %c0_2 = arith.constant 0 : index
    %1 = vector.load %arg1[%c0, %c0_0, %c0_1, %c0_2] : memref<1x1x18x48xbf16, #tpu.memory_space<vmem>>, vector<1x1x16x48xbf16>
    %2 = vector.shape_cast %1 : vector<1x1x16x48xbf16> to vector<1x16x48xbf16>
    %3 = vector.shape_cast %2 : vector<1x16x48xbf16> to vector<16x48xbf16>
    %c0_3 = arith.constant 0 : index
    %c0_4 = arith.constant 0 : index
    %c0_5 = arith.constant 0 : index
    %4 = vector.load %arg2[%c0_3, %c0_4, %c0_5] : memref<3x48x256xbf16, #tpu.memory_space<vmem>>, vector<1x48x256xbf16>
    %5 = vector.shape_cast %4 : vector<1x48x256xbf16> to vector<48x256xbf16>
    %cst_6 = arith.constant dense<0.000000e+00> : vector<16x256xf32>
    %6 = tpu.matmul %3, %5, %cst_6 {dimension_numbers = #tpu.dot_dimension_numbers<[1], [0], [0], [1], [0, 0, 1, 1], [], []>} : vector<16x48xbf16>, vector<48x256xbf16>, vector<16x256xf32> -> vector<16x256xf32>
    %7 = arith.addf %0, %6 : vector<16x256xf32>
    %c0_7 = arith.constant 0 : index
    %c0_8 = arith.constant 0 : index
    %c1 = arith.constant 1 : index
    %c0_9 = arith.constant 0 : index
    %8 = vector.load %arg1[%c0_7, %c0_8, %c1, %c0_9] : memref<1x1x18x48xbf16, #tpu.memory_space<vmem>>, vector<1x1x16x48xbf16>
    %9 = vector.shape_cast %8 : vector<1x1x16x48xbf16> to vector<1x16x48xbf16>
    %10 = vector.shape_cast %9 : vector<1x16x48xbf16> to vector<16x48xbf16>
    %c1_10 = arith.constant 1 : index
    %c0_11 = arith.constant 0 : index
    %c0_12 = arith.constant 0 : index
    %11 = vector.load %arg2[%c1_10, %c0_11, %c0_12] : memref<3x48x256xbf16, #tpu.memory_space<vmem>>, vector<1x48x256xbf16>
    %12 = vector.shape_cast %11 : vector<1x48x256xbf16> to vector<48x256xbf16>
    %cst_13 = arith.constant dense<0.000000e+00> : vector<16x256xf32>
    %13 = tpu.matmul %10, %12, %cst_13 {dimension_numbers = #tpu.dot_dimension_numbers<[1], [0], [0], [1], [0, 0, 1, 1], [], []>} : vector<16x48xbf16>, vector<48x256xbf16>, vector<16x256xf32> -> vector<16x256xf32>
    %14 = arith.addf %7, %13 : vector<16x256xf32>
    %c0_14 = arith.constant 0 : index
    %c0_15 = arith.constant 0 : index
    %c2 = arith.constant 2 : index
    %c0_16 = arith.constant 0 : index
    %15 = vector.load %arg1[%c0_14, %c0_15, %c2, %c0_16] : memref<1x1x18x48xbf16, #tpu.memory_space<vmem>>, vector<1x1x16x48xbf16>
    %16 = vector.shape_cast %15 : vector<1x1x16x48xbf16> to vector<1x16x48xbf16>
    %17 = vector.shape_cast %16 : vector<1x16x48xbf16> to vector<16x48xbf16>
    %c2_17 = arith.constant 2 : index
    %c0_18 = arith.constant 0 : index
    %c0_19 = arith.constant 0 : index
    %18 = vector.load %arg2[%c2_17, %c0_18, %c0_19] : memref<3x48x256xbf16, #tpu.memory_space<vmem>>, vector<1x48x256xbf16>
    %19 = vector.shape_cast %18 : vector<1x48x256xbf16> to vector<48x256xbf16>
    %cst_20 = arith.constant dense<0.000000e+00> : vector<16x256xf32>
    %20 = tpu.matmul %17, %19, %cst_20 {dimension_numbers = #tpu.dot_dimension_numbers<[1], [0], [0], [1], [0, 0, 1, 1], [], []>} : vector<16x48xbf16>, vector<48x256xbf16>, vector<16x256xf32> -> vector<16x256xf32>
    %21 = arith.addf %14, %20 : vector<16x256xf32>
    %c0_21 = arith.constant 0 : index
    %c0_22 = arith.constant 0 : index
    %22 = vector.load %arg3[%c0_21, %c0_22] : memref<1x256xf32, #tpu.memory_space<vmem>>, vector<1x256xf32>
    %23 = vector.broadcast %22 : vector<1x256xf32> to vector<16x256xf32>
    %24 = arith.addf %21, %23 : vector<16x256xf32>
    %cst_23 = arith.constant 0.000000e+00 : f32
    %25 = vector.broadcast %cst_23 : f32 to vector<16x256xf32>
    %26 = arith.maximumf %24, %25 : vector<16x256xf32>
    %cst_24 = arith.constant 0.000000e+00 : bf16
    %27 = vector.broadcast %cst_24 : bf16 to vector<1x1x256xbf16>
    %c0_25 = arith.constant 0 : index
    %c0_26 = arith.constant 0 : index
    %c0_27 = arith.constant 0 : index
    %28 = vector.load %arg7[%c0_25, %c0_26, %c0_27] : memref<1x18x256xbf16, #tpu.memory_space<vmem>>, vector<1x1x256xbf16>
    tpu.vector_store %arg7[%c0_25, %c0_26, %c0_27], %27 {strides = array<i32>} : memref<1x18x256xbf16, #tpu.memory_space<vmem>>, vector<1x1x256xbf16>,
    %c0_28 = arith.constant 0 : index
    %c17 = arith.constant 17 : index
    %c0_29 = arith.constant 0 : index
    %29 = vector.load %arg7[%c0_28, %c17, %c0_29] : memref<1x18x256xbf16, #tpu.memory_space<vmem>>, vector<1x1x256xbf16>
    tpu.vector_store %arg7[%c0_28, %c17, %c0_29], %27 {strides = array<i32>} : memref<1x18x256xbf16, #tpu.memory_space<vmem>>, vector<1x1x256xbf16>,
    %30 = arith.truncf %26 : vector<16x256xf32> to vector<16x256xbf16>
    %31 = vector.shape_cast %30 : vector<16x256xbf16> to vector<1x16x256xbf16>
    %c0_30 = arith.constant 0 : index
    %c1_31 = arith.constant 1 : index
    %c0_32 = arith.constant 0 : index
    %32 = vector.load %arg7[%c0_30, %c1_31, %c0_32] : memref<1x18x256xbf16, #tpu.memory_space<vmem>>, vector<1x16x256xbf16>
    tpu.vector_store %arg7[%c0_30, %c1_31, %c0_32], %31 {strides = array<i32>} : memref<1x18x256xbf16, #tpu.memory_space<vmem>>, vector<1x16x256xbf16>,
    %cst_33 = arith.constant 0.000000e+00 : f32
    %33 = vector.broadcast %cst_33 : f32 to vector<16x512xf32>
    %c0_34 = arith.constant 0 : index
    %c0_35 = arith.constant 0 : index
    %c0_36 = arith.constant 0 : index
    %34 = vector.load %arg7[%c0_34, %c0_35, %c0_36] : memref<1x18x256xbf16, #tpu.memory_space<vmem>>, vector<1x16x256xbf16>
    %35 = vector.shape_cast %34 : vector<1x16x256xbf16> to vector<16x256xbf16>
    %c0_37 = arith.constant 0 : index
    %c0_38 = arith.constant 0 : index
    %c0_39 = arith.constant 0 : index
    %36 = vector.load %arg4[%c0_37, %c0_38, %c0_39] : memref<3x256x512xbf16, #tpu.memory_space<vmem>>, vector<1x256x512xbf16>
    %37 = vector.shape_cast %36 : vector<1x256x512xbf16> to vector<256x512xbf16>
    %cst_40 = arith.constant dense<0.000000e+00> : vector<16x512xf32>
    %38 = tpu.matmul %35, %37, %cst_40 {dimension_numbers = #tpu.dot_dimension_numbers<[1], [0], [0], [1], [0, 0, 1, 1], [], []>} : vector<16x256xbf16>, vector<256x512xbf16>, vector<16x512xf32> -> vector<16x512xf32>
    %39 = arith.addf %33, %38 : vector<16x512xf32>
    %c0_41 = arith.constant 0 : index
    %c1_42 = arith.constant 1 : index
    %c0_43 = arith.constant 0 : index
    %40 = vector.load %arg7[%c0_41, %c1_42, %c0_43] : memref<1x18x256xbf16, #tpu.memory_space<vmem>>, vector<1x16x256xbf16>
    %41 = vector.shape_cast %40 : vector<1x16x256xbf16> to vector<16x256xbf16>
    %c1_44 = arith.constant 1 : index
    %c0_45 = arith.constant 0 : index
    %c0_46 = arith.constant 0 : index
    %42 = vector.load %arg4[%c1_44, %c0_45, %c0_46] : memref<3x256x512xbf16, #tpu.memory_space<vmem>>, vector<1x256x512xbf16>
    %43 = vector.shape_cast %42 : vector<1x256x512xbf16> to vector<256x512xbf16>
    %cst_47 = arith.constant dense<0.000000e+00> : vector<16x512xf32>
    %44 = tpu.matmul %41, %43, %cst_47 {dimension_numbers = #tpu.dot_dimension_numbers<[1], [0], [0], [1], [0, 0, 1, 1], [], []>} : vector<16x256xbf16>, vector<256x512xbf16>, vector<16x512xf32> -> vector<16x512xf32>
    %45 = arith.addf %39, %44 : vector<16x512xf32>
    %c0_48 = arith.constant 0 : index
    %c2_49 = arith.constant 2 : index
    %c0_50 = arith.constant 0 : index
    %46 = vector.load %arg7[%c0_48, %c2_49, %c0_50] : memref<1x18x256xbf16, #tpu.memory_space<vmem>>, vector<1x16x256xbf16>
    %47 = vector.shape_cast %46 : vector<1x16x256xbf16> to vector<16x256xbf16>
    %c2_51 = arith.constant 2 : index
    %c0_52 = arith.constant 0 : index
    %c0_53 = arith.constant 0 : index
    %48 = vector.load %arg4[%c2_51, %c0_52, %c0_53] : memref<3x256x512xbf16, #tpu.memory_space<vmem>>, vector<1x256x512xbf16>
    %49 = vector.shape_cast %48 : vector<1x256x512xbf16> to vector<256x512xbf16>
    %cst_54 = arith.constant dense<0.000000e+00> : vector<16x512xf32>
    %50 = tpu.matmul %47, %49, %cst_54 {dimension_numbers = #tpu.dot_dimension_numbers<[1], [0], [0], [1], [0, 0, 1, 1], [], []>} : vector<16x256xbf16>, vector<256x512xbf16>, vector<16x512xf32> -> vector<16x512xf32>
    %51 = arith.addf %45, %50 : vector<16x512xf32>
    %c0_55 = arith.constant 0 : index
    %c0_56 = arith.constant 0 : index
    %52 = vector.load %arg5[%c0_55, %c0_56] : memref<1x512xf32, #tpu.memory_space<vmem>>, vector<1x512xf32>
    %53 = vector.broadcast %52 : vector<1x512xf32> to vector<16x512xf32>
    %54 = arith.addf %51, %53 : vector<16x512xf32>
    %cst_57 = arith.constant 0.000000e+00 : f32
    %55 = vector.broadcast %cst_57 : f32 to vector<16x512xf32>
    %56 = arith.maximumf %54, %55 : vector<16x512xf32>
    %57 = vector.shape_cast %56 : vector<16x512xf32> to vector<1x16x512xf32>
    %cst_58 = arith.constant dense<0.000000e+00> : vector<1x512xf32>
    %58 = vector.multi_reduction <add>, %57, %cst_58 [1] : vector<1x16x512xf32> to vector<1x512xf32>
    %59 = vector.shape_cast %58 : vector<1x512xf32> to vector<1x16x32xf32>
    %cst_59 = arith.constant dense<0.000000e+00> : vector<1x32xf32>
    %60 = vector.multi_reduction <add>, %59, %cst_59 [1] : vector<1x16x32xf32> to vector<1x32xf32>
    %cst_60 = arith.constant 3.906250e-03 : f32
    %61 = vector.broadcast %cst_60 : f32 to vector<1x32xf32>
    %62 = arith.mulf %60, %61 : vector<1x32xf32>
    %c0_61 = arith.constant 0 : index
    %c0_62 = arith.constant 0 : index
    %c0_63 = arith.constant 0 : index
    %63 = vector.load %arg6[%c0_61, %c0_62, %c0_63] : memref<1x1x32xf32, #tpu.memory_space<vmem>>, vector<1x1x32xf32>
    %64 = vector.shape_cast %63 : vector<1x1x32xf32> to vector<1x32xf32>
    %65 = vector.shape_cast %62 : vector<1x32xf32> to vector<1x1x32xf32>
    tpu.vector_store %arg6[%c0_61, %c0_62, %c0_63], %65 {strides = array<i32>} : memref<1x1x32xf32, #tpu.memory_space<vmem>>, vector<1x1x32xf32>,
    return
  }
  func.func @transform_0(%arg0: i32) -> (i32, i32, i32, i32) {
    %c0_i32 = arith.constant 0 : i32
    %c0_i32_0 = arith.constant 0 : i32
    %c0_i32_1 = arith.constant 0 : i32
    %c0_i32_2 = arith.constant 0 : i32
    return %arg0, %c0_i32, %c0_i32_0, %c0_i32_1 : i32, i32, i32, i32
  }
  func.func @transform_1(%arg0: i32) -> (i32, i32, i32) {
    %c0_i32 = arith.constant 0 : i32
    %c0_i32_0 = arith.constant 0 : i32
    %c0_i32_1 = arith.constant 0 : i32
    %c0_i32_2 = arith.constant 0 : i32
    return %c0_i32, %c0_i32_0, %c0_i32_1 : i32, i32, i32
  }
  func.func @transform_2(%arg0: i32) -> (i32, i32) {
    %c0_i32 = arith.constant 0 : i32
    %c0_i32_0 = arith.constant 0 : i32
    %c0_i32_1 = arith.constant 0 : i32
    return %c0_i32, %c0_i32_0 : i32, i32
  }
  func.func @transform_3(%arg0: i32) -> (i32, i32, i32) {
    %c0_i32 = arith.constant 0 : i32
    %c0_i32_0 = arith.constant 0 : i32
    %c0_i32_1 = arith.constant 0 : i32
    %c0_i32_2 = arith.constant 0 : i32
    return %c0_i32, %c0_i32_0, %c0_i32_1 : i32, i32, i32
  }
  func.func @transform_4(%arg0: i32) -> (i32, i32) {
    %c0_i32 = arith.constant 0 : i32
    %c0_i32_0 = arith.constant 0 : i32
    %c0_i32_1 = arith.constant 0 : i32
    return %c0_i32, %c0_i32_0 : i32, i32
  }
  func.func @transform_5(%arg0: i32) -> (i32, i32, i32) {
    %c0_i32 = arith.constant 0 : i32
    %c0_i32_0 = arith.constant 0 : i32
    %c0_i32_1 = arith.constant 0 : i32
    return %arg0, %c0_i32, %c0_i32_0 : i32, i32, i32
  }
}

</mosaic_0001>

<bundles_post_ra>
// kernel: tile.18
= control target key start
LH: loop header
LB: loop body
LE: loop exit
PB: predicated region body
PF: predicated region fallthrough
CT: control target
= control target key end

     0   :  { %s28_s0 = inlined_call_operand.vmem [shape: f32[32], index: 0, kind: input, shape index: {}]   ;;  %s29_s1 = inlined_call_operand.vmem [shape: f32[16,32], index: 1, kind: output, shape index: {}]  }
   0x1   :  { %v4_v0 = vld [vmem:[%s28_s0] ss:$0 sm:$0xff] }
   0x2   :  { %5 = vst [vmem:[%s29_s1] sm:$0xff] %v4_v0  ;;  %8 = vst [vmem:[%s29_s1 + $0x8] sm:$0xff] %v4_v0 }

// kernel: tile.19
= control target key start
LH: loop header
LB: loop body
LE: loop exit
PB: predicated region body
PF: predicated region fallthrough
CT: control target
= control target key end

     0   :  { %s62_s8 = smov 96   ;;  %vm3_vm0 = vcmask 261120   ;;  %s64_s15 = smov 64   ;;  %vm9_vm1 = vcmask 1048320   ;;  %vm15_vm2 = vcmask 785920   ;;  %vm21_vm3 = vcmask 523520   ;;  %s99_s0 = inlined_call_operand.vmem [shape: f32[16,32], index: 0, kind: input, shape index: {}]   ;;  %s100_s1 = inlined_call_operand.vmem [shape: f32[1,512], index: 1, kind: output, shape index: {}]  }
   0x1   :  { %v53_v0 = vld [vmem:[%s99_s0 + $0x3] ss:$4 sm:$0xf]   ;;  %v54_v1 = vld [vmem:[%s99_s0 + $0x2] ss:$4 sm:$0xf]  }
   0x2   :  { %7 = vrot.lane.b32.xlu0 %v53_v0, %s62_s8  ;;  %v55_v2 = vld [vmem:[%s99_s0 + $0x1] ss:$4 sm:$0xf]   ;;  %v2_v3 = vld [vmem:[%s99_s0] ss:$4 sm:$0xf]  }
   0x3   :  { %s63_s0 = smov 32   ;;  %4 = vst.msk [vmem:[#allocation0] ss:$8 sm:$0xf] %vm3_vm0, %v2_v3  }
   0x4   :  { %19 = vrot.lane.b32.xlu1 %v55_v2, %s63_s0 }
   0x6   :  { %13 = vrot.lane.b32.xlu0 %v54_v1, %s64_s15 }
  0x74   :  { %v8_v4 = vpop.permute.xlu0 %7  }
  0x75   :  { %10 = vst.msk [vmem:[#allocation0] ss:$8 sm:$0xf] %vm9_vm1, %v8_v4  }
  0x76   :  { %v20_v5 = vpop.permute.xlu1 %19  }
  0x78   :  { %v14_v6 = vpop.permute.xlu0 %13  }
  0x79   :  { %16 = vst.msk [vmem:[#allocation0] ss:$8 sm:$0xf] %vm15_vm2, %v14_v6  }
  0x7a   :  { %22 = vst.msk [vmem:[#allocation0] ss:$8 sm:$0xf] %vm21_vm3, %v20_v5  }
  0x81   :  { %v27_v7 = vld [vmem:[#allocation0] sm:$0x1]  ;;  %v32_v8 = vld [vmem:[#allocation0 + $0x8] sm:$0x1]  ;;  %v38_v9 = vld [vmem:[#allocation0 + $0x10] sm:$0x1] }
  0x82   :  { %30 = vst [vmem:[%s100_s1] sm:$0x1] %v27_v7  ;;  %56 = vst [vmem:[%s100_s1 + $0x1] sm:$0x1] %v32_v8  ;;  %v45_v10 = vld [vmem:[#allocation0 + $0x18] sm:$0x1] }
  0x83   :  { %57 = vst [vmem:[%s100_s1 + $0x2] sm:$0x1] %v38_v9  ;;  %58 = vst [vmem:[%s100_s1 + $0x3] sm:$0x1] %v45_v10 }

// kernel: tile.13
= control target key start
LH: loop header
LB: loop body
LE: loop exit
PB: predicated region body
PF: predicated region fallthrough
CT: control target
= control target key end

     0   :  { %s28_s0 = inlined_call_operand.vmem [shape: f32[16], index: 0, kind: input, shape index: {}]   ;;  %s29_s1 = inlined_call_operand.vmem [shape: f32[16,16], index: 1, kind: output, shape index: {}]  }
   0x1   :  { %v4_v0 = vld [vmem:[%s28_s0] ss:$0 sm:$0xff] }
   0x2   :  { %5 = vst [vmem:[%s29_s1] sm:$0xff] %v4_v0  ;;  %8 = vst [vmem:[%s29_s1 + $0x8] sm:$0xff] %v4_v0 }

// kernel: tile.14
= control target key start
LH: loop header
LB: loop body
LE: loop exit
PB: predicated region body
PF: predicated region fallthrough
CT: control target
= control target key end

     0   :  { %s7_s6 = smov 3  ;;  %s21_s9 = smov 3  ;;  %vm4_vm0 = vcmask 130048   ;;  %vm11_vm1 = vcmask 1048448   ;;  %vm18_vm2 = vcmask 917248   ;;  %vm25_vm3 = vcmask 786048   ;;  %s131_s0 = inlined_call_operand.vmem [shape: f32[16,16], index: 0, kind: input, shape index: {}]   ;;  %s132_s1 = inlined_call_operand.vmem [shape: f32[1,256], index: 1, kind: output, shape index: {}]  }
   0x1   :  { %v69_v0 = vld [vmem:[%s131_s0 + $0x7] ss:$8 sm:%s7_s6]   ;;  %s84_s10 = smov 112   ;;  %v71_v1 = vld [vmem:[%s131_s0 + $0x5] ss:$8 sm:%s21_s9]   ;;  %s14_s13 = smov 3 }
   0x2   :  { %9 = vrot.lane.b32.xlu0 %v69_v0, %s84_s10  ;;  %s85_s14 = smov 80   ;;  %v70_v2 = vld [vmem:[%s131_s0 + $0x6] ss:$8 sm:%s14_s13]   ;;  %s28_s17 = smov 3  ;;  %vm32_vm4 = vcmask 654848   ;;  %vm39_vm5 = vcmask 523648  }
   0x3   :  { %23 = vrot.lane.b32.xlu1 %v71_v1, %s85_s14  ;;  %v72_v3 = vld [vmem:[%s131_s0 + $0x4] ss:$8 sm:%s28_s17]   ;;  %s35_s20 = smov 3  ;;  %s42_s21 = smov 3  ;;  %vm46_vm6 = vcmask 392448   ;;  %vm53_vm7 = vcmask 261248  }
   0x4   :  { %s86_s22 = smov 96   ;;  %s87_s23 = smov 64   ;;  %v73_v4 = vld [vmem:[%s131_s0 + $0x3] ss:$8 sm:%s35_s20]   ;;  %v74_v5 = vld [vmem:[%s131_s0 + $0x2] ss:$8 sm:%s42_s21]  }
   0x5   :  { %s2_s26 = smov 3  ;;  %s49_s29 = smov 3 }
   0x6   :  { %16 = vrot.lane.b32.xlu0 %v70_v2, %s86_s22  ;;  %v3_v6 = vld [vmem:[%s131_s0] ss:$8 sm:%s2_s26]   ;;  %s88_s3 = smov 48   ;;  %s89_s4 = smov 32  }
   0x7   :  { %30 = vrot.lane.b32.xlu1 %v72_v3, %s87_s23  ;;  %5 = vst.msk [vmem:[#allocation0] ss:$8 sm:$0x3] %vm4_vm0, %v3_v6   ;;  %v75_v7 = vld [vmem:[%s131_s0 + $0x1] ss:$8 sm:%s49_s29]   ;;  %s90_s0 = smov 16  }
   0xa   :  { %37 = vrot.lane.b32.xlu0 %v73_v4, %s88_s3 }
   0xb   :  { %44 = vrot.lane.b32.xlu1 %v74_v5, %s89_s4 }
   0xe   :  { %51 = vrot.lane.b32.xlu0 %v75_v7, %s90_s0 }
  0x74   :  { %v10_v8 = vpop.permute.xlu0 %9  }
  0x75   :  { %12 = vst.msk [vmem:[#allocation0] ss:$8 sm:$0x3] %vm11_vm1, %v10_v8   ;;  %v24_v9 = vpop.permute.xlu1 %23  }
  0x78   :  { %v17_v10 = vpop.permute.xlu0 %16  }
  0x79   :  { %19 = vst.msk [vmem:[#allocation0] ss:$8 sm:$0x3] %vm18_vm2, %v17_v10   ;;  %v31_v11 = vpop.permute.xlu1 %30  }
  0x7a   :  { %26 = vst.msk [vmem:[#allocation0] ss:$8 sm:$0x3] %vm25_vm3, %v24_v9  }
  0x7b   :  { %33 = vst.msk [vmem:[#allocation0] ss:$8 sm:$0x3] %vm32_vm4, %v31_v11  }
  0x7c   :  { %v38_v12 = vpop.permute.xlu0 %37  }
  0x7d   :  { %40 = vst.msk [vmem:[#allocation0] ss:$8 sm:$0x3] %vm39_vm5, %v38_v12   ;;  %v45_v13 = vpop.permute.xlu1 %44  }
  0x7e   :  { %47 = vst.msk [vmem:[#allocation0] ss:$8 sm:$0x3] %vm46_vm6, %v45_v13  }
  0x80   :  { %v52_v14 = vpop.permute.xlu0 %51  }
  0x81   :  { %54 = vst.msk [vmem:[#allocation0] ss:$8 sm:$0x3] %vm53_vm7, %v52_v14  }
  0x88   :  { %v59_v15 = vld [vmem:[#allocation0] sm:$0x1]  ;;  %v64_v16 = vld [vmem:[#allocation0 + $0x8] sm:$0x1] }
  0x89   :  { %62 = vst [vmem:[%s132_s1] sm:$0x1] %v59_v15  ;;  %76 = vst [vmem:[%s132_s1 + $0x1] sm:$0x1] %v64_v16 }

// kernel: level_model_forward.1
= control target key start
LH: loop header
LB: loop body
LE: loop exit
PB: predicated region body
PF: predicated region fallthrough
CT: control target
= control target key end

     0   :  { %10 = vsyncpa [#allocation4], 0  ;;  %s4002_s0 = inlined_call_operand.vmem [shape: bf16[2,1,18,48], index: 0, kind: input, shape index: {}]   ;;  %s4003_s1 = inlined_call_operand.vmem [shape: bf16[3,48,256], index: 1, kind: input, shape index: {}]   ;;  %s4004_s2 = inlined_call_operand.vmem [shape: f32[1,256], index: 2, kind: input, shape index: {}]   ;;  %s4005_s3 = inlined_call_operand.vmem [shape: bf16[3,256,512], index: 3, kind: input, shape index: {}]   ;;  %s4006_s4 = inlined_call_operand.vmem [shape: f32[1,512], index: 4, kind: input, shape index: {}]   ;;  %s4007_s5 = inlined_call_operand.hbm [shape: f32[2,1,32], index: 5, kind: output, shape index: {}]  }
   0x1   :  { %12 = vsyncpa [#allocation4 + $0x1], 0  ;;  %s3191_s18 = smov 0   ;;  %s3193_s19 = smov 0  }
   0x2   :  { %s3195_s20 = smov 0   ;;  %s3197_s21 = smov 0  }
   0x3 LB: > { %s3212_s22 = sadd.s32 4294967295, %s3152_s21   ;;  %s2352_s23 = sadd.s32 4294967294, %s3152_s21   ;;  %s3152_s21 = sphi %s3197_s21, %s4021_s21   ;;  %s3148_s20 = sphi %s3195_s20, %s4020_s20   ;;  %s3144_s19 = sphi %s3193_s19, %s4019_s19   ;;  %s3140_s18 = sphi %s3191_s18, %s4018_s18  }
   0x4   : > { %s3216_s24 = sadd.s32 1, %s3152_s21   ;;  %s135_s25 = sadd.s32 1, %s3148_s20 }
   0x5   : > { %s132_s26 = ssub.s32 %s3152_s21, %s3216_s24  ;;  %p145_p0 = scmp.ne.s32.totalorder %s3148_s20, %s3144_s19 }
   0x6   : > { %p133_p1 = scmp.eq.s32.totalorder %s132_s26, 0  ;;  %p146_p2 = scmp.eq.s32.totalorder %s3212_s22, 1 }
   0x7   : > { %p151_p3 = scmp.ne.s32.totalorder %s3144_s19, %s3140_s18  ;;  %p152_p4 = scmp.eq.s32.totalorder %s2352_s23, 1 }
   0x8   : > { %s3227_s27 = scalar_select %p133_p1, %s3148_s20, %s135_s25  }
   0x9   : > { %p3229_p5 = por %p146_p2, %p145_p0  ;;  %p3233_p6 = por %p152_p4, %p151_p3 }
   0xa   : > { %p2355_p7 = scmp.ge.s32.totalorder %s3152_s21, 1  ;;  %p190_p8 = scmp.lt.s32.totalorder %s3152_s21, 3 }
   0xc   : > { %p191_p9 = pnand %p2355_p7, %p190_p8 }
   0xd   : > { %p217_p10 = scmp.lt.s32.totalorder (!%p191_p9), %s3212_s22, 1  ;;  %s3156_s25 = smov (!%p191_p9), 96  }
   0xe   : > { %194 = sbr.rel (%p191_p9) target bundleno = 796 (0x31c), region = 40  ;;  %s215_s30 = sand.u32 (!%p191_p9), 1, %s3144_s19  }
   0xf   : > { %s2721_s6 = sshll.u32 (!%p191_p9), %s3212_s22, 4  ;;  %s216_s7 = scalar_lea.vmem (!%p191_p9), [#allocation3], %s215_s30 }
  0x10   : > { %s2297_s8 = sshll.u32 (!%p191_p9), %s216_s7, 4  ;;  %s2295_s12 = scalar_lea.hbm (!%p191_p9), %s4007_s5, %s2721_s6  ;;  %s2298_s8 = int_to_ptr.vmem [resolvable:$true] %s2297_s8 }
  0x11   : > { %s2285_s14 = scalar_lea.sflag (!%p191_p9), [#allocation4], %s215_s30  ;;  %s3160_s15 = smov (!%p191_p9), [#allocation3]  }
  0x12   : > { %s3096_s16 = sshll.u32 (!%p191_p9), %s3160_s15, 4  ;;  %s3097_s16 = int_to_ptr.vmem [resolvable:$false] %s3096_s16 }
  0x13   : > { %v2772_v0 = vld [vmem:[%s4003_s1 + $0x54] ss:$8 sps:$4 sm:$0xff]   ;;  %v2774_v1 = vld [vmem:[%s4003_s1 + $0x50] ss:$8 sps:$4 sm:$0xff]   ;;  %v3154_v2 = vmov 0   ;;  %s218_s13 = scalar_select %p217_p10, %s3212_s22, 1 }
  0x14   : > { %326 = vmatprep.mubr.bf16.mxu0 %v3154_v2  ;;  %401 = vmatprep.mubr.bf16.mxu1 %v3154_v2  ;;  %v2775_v3 = vld [vmem:[%s4003_s1 + $0x24] ss:$8 sps:$4 sm:$0xff]   ;;  %v2777_v4 = vld [vmem:[%s4003_s1 + $0x20] ss:$8 sps:$4 sm:$0xff]   ;;  %v2781_v7 = vld [vmem:[%s4003_s1 + $0x14] ss:$8 sps:$4 sm:$0xff]   ;;  %p3099_p0 = scmp.lt.s32.totalorder %s2298_s8, %s3097_s16 }
  0x15   : > { %304 = vmatprep.subr.bf16.mxu0 %v2772_v0  ;;  %v2778_v5 = vld [vmem:[%s4003_s1 + $0x44] ss:$8 sps:$4 sm:$0xff]   ;;  %v2780_v6 = vld [vmem:[%s4003_s1 + $0x40] ss:$8 sps:$4 sm:$0xff]   ;;  %379 = vmatprep.subr.bf16.mxu1 %v2775_v3  ;;  %s2726_s26 = smul.u32 12, %s218_s13  ;;  %vm290_vm0 = vcmask 392192  }
  0x16   : > { %305 = vmatpush1.bf16.msra.mxu0 %v2774_v1  ;;  %380 = vmatpush1.bf16.msra.mxu1 %v2777_v4  ;;  %v2783_v8 = vld [vmem:[%s4003_s1 + $0x10] ss:$8 sps:$4 sm:$0xff]   ;;  %v2784_v9 = vld [vmem:[%s4003_s1 + $0x34] ss:$8 sps:$4 sm:$0xff]   ;;  %v2787_v11 = vld [vmem:[%s4003_s1 + $0x4] ss:$8 sps:$4 sm:$0xff]  }
  0x17   : > { %306 = vmatprep.subr.bf16.mxu0 %v2778_v5  ;;  %381 = vmatprep.subr.bf16.mxu1 %v2781_v7  ;;  %s221_s11 = scalar_lea.vmem %s4002_s0, %s2726_s26  ;;  %v2786_v10 = vld [vmem:[%s4003_s1 + $0x30] ss:$8 sps:$4 sm:$0xff]   ;;  %v2789_v12 = vld [vmem:[%s4003_s1] ss:$8 sps:$4 sm:$0xff]   ;;  %v2792_v13 = vld [vmem:[%s4003_s1 + $0x84] ss:$8 sps:$4 sm:$0xff]  }
  0x18   : > { %v223_v14 = vld [vmem:[%s221_s11] sm:$0xf]  ;;  %v224_v15 = vld [vmem:[%s221_s11 + $0x4] sm:$0xf]  ;;  %vm247_vm1 = vsmask.f32 7424 }
  0x19   : > { %v2363_v16 = vcombine.low %v223_v14, %v224_v15  ;;  %v2794_v17 = vld [vmem:[%s221_s11 + $0x8] ss:$0 sps:$4 sm:$0x11]   ;;  %v2802_v23 = vld [vmem:[%s4005_s3 + $0x2e0] ss:$16 sps:$4 sm:$0xff]   ;;  %vm423_vm2 = vcmask 1046528  }
  0x1a   : > { %307 = vmatpush1.bf16.msra.mxu0 %v2780_v6  ;;  %382 = vmatpush1.bf16.msra.mxu1 %v2783_v8  ;;  %v256_v20 = vshll.u32 %v2794_v17, 16  ;;  %v2804_v24 = vld [vmem:[%s4005_s3 + $0x2e4] ss:$16 sps:$4 sm:$0xff]   ;;  %v2790_v25 = vld [vmem:[%s4003_s1 + $0x80] ss:$8 sps:$4 sm:$0xff]   ;;  %v425_v38 = vrot.slane %v2794_v17, 1 }
  0x1b   : > { %308 = vmatprep.subr.bf16.mxu0 %v2784_v9  ;;  %383 = vmatprep.subr.bf16.mxu1 %v2787_v11  ;;  %v249_v18 = vshrl.u32 %v2363_v16, 16  ;;  %v251_v19 = vshll.u32 %v2363_v16, 16  ;;  %v2797_v27 = vld [vmem:[%s4003_s1 + $0x74] ss:$8 sps:$4 sm:$0xff]   ;;  %v412_v28 = vld [vmem:[%s221_s11] sm:$0xe] }
  0x1c   : > { %v258_v22 = vrot.slane %v256_v20, 1  ;;  %v2810_v29 = vld [vmem:[%s4005_s3 + $0x2c4] ss:$16 sps:$4 sm:$0xff]   ;;  %v2808_v31 = vld [vmem:[%s4005_s3 + $0x2c0] ss:$16 sps:$4 sm:$0xff]   ;;  %v2385_v33 = vcombine.low %v412_v28, %v224_v15  ;;  %vm527_vm3 = vcmask 1040384  }
  0x1d   : > { %v253_v21 = vrot.slane %v251_v19, 1  ;;  %v2795_v32 = vld [vmem:[%s4003_s1 + $0x70] ss:$8 sps:$4 sm:$0xff]   ;;  %v2816_v34 = vld [vmem:[%s4005_s3 + $0x2a4] ss:$16 sps:$4 sm:$0xff]   ;;  %vm530_vm5 = vcmask 1044484  }
  0x1e   : > { %309 = vmatpush1.bf16.msra.mxu0 %v2786_v10  ;;  %384 = vmatpush1.bf16.msra.mxu1 %v2789_v12  ;;  %v2800_v35 = vld [vmem:[%s4003_s1 + $0x64] ss:$8 sps:$4 sm:$0xff]   ;;  %v2798_v36 = vld [vmem:[%s4003_s1 + $0x60] ss:$8 sps:$4 sm:$0xff]   ;;  %v424_v40 = vrot.slane %v2385_v33, 1  ;;  %vm577_vm15 = vcmask 1043456  }
  0x1f   : > { %470 = vmatprep.subr.bf16.mxu0 %v2792_v13  ;;  %v254_v26 = vor.u32 %v253_v21, %v249_v18  ;;  %1080 = vmatprep.subr.bf16.mxu1 %v2804_v24  ;;  %v2814_v37 = vld [vmem:[%s4005_s3 + $0x2a0] ss:$16 sps:$4 sm:$0xff]   ;;  %v2822_v39 = vld [vmem:[%s4005_s3 + $0x284] ss:$16 sps:$4 sm:$0xff]   ;;  %v2807_v41 = vld [vmem:[%s4005_s3 + $0x2ec] ss:$16 sps:$4 sm:$0xff]  }
  0x20   : > { %v2820_v42 = vld [vmem:[%s4005_s3 + $0x280] ss:$16 sps:$4 sm:$0xff]   ;;  %v2805_v43 = vld [vmem:[%s4005_s3 + $0x2e8] ss:$16 sps:$4 sm:$0xff]   ;;  %v2813_v44 = vld [vmem:[%s4005_s3 + $0x2cc] ss:$16 sps:$4 sm:$0xff]   ;;  %v426_v45 = vsel %vm423_vm2, %v424_v40, %v425_v38 }
  0x21   : > { %2378 = vmatmul.mubr.msk.bf16.vlgmr.msra.gmra.mxu1 %vm290_vm0, %v2363_v16  ;;  %v259_v30 = vsel %vm247_vm1, %v254_v26, %v258_v22  ;;  %v2811_v46 = vld [vmem:[%s4005_s3 + $0x2c8] ss:$16 sps:$4 sm:$0xff]   ;;  %v2819_v47 = vld [vmem:[%s4005_s3 + $0x2ac] ss:$16 sps:$4 sm:$0xff]   ;;  %v2828_v51 = vld [vmem:[%s4005_s3 + $0x264] ss:$16 sps:$4 sm:$0xff]  }
  0x22   : > { %1081 = vmatpush1.bf16.msra.mxu1 %v2802_v23  ;;  %2371 = vmatmul.mubr.msk.bf16.vlgmr.msra.gmra.mxu0 %vm290_vm0, %v259_v30  ;;  %v2817_v48 = vld [vmem:[%s4005_s3 + $0x2a8] ss:$16 sps:$4 sm:$0xff]   ;;  %v2825_v49 = vld [vmem:[%s4005_s3 + $0x28c] ss:$16 sps:$4 sm:$0xff]   ;;  %v2826_v53 = vld [vmem:[%s4005_s3 + $0x260] ss:$16 sps:$4 sm:$0xff]  }
  0x23   : > { %1082 = vmatprep.subr.bf16.mxu1 %v2810_v29  ;;  %471 = vmatpush1.bf16.msra.mxu0 %v2790_v25  ;;  %v2823_v50 = vld [vmem:[%s4005_s3 + $0x288] ss:$16 sps:$4 sm:$0xff]   ;;  %v2831_v52 = vld [vmem:[%s4005_s3 + $0x26c] ss:$16 sps:$4 sm:$0xff]   ;;  %v2834_v55 = vld [vmem:[%s4005_s3 + $0x244] ss:$16 sps:$4 sm:$0xff]  }
  0x24   : > { %492 = vmatprep.mubr.bf16.mxu0 %v3154_v2  ;;  %472 = vmatprep.subr.bf16.mxu0 %v2797_v27  ;;  %v2829_v54 = vld [vmem:[%s4005_s3 + $0x268] ss:$16 sps:$4 sm:$0xff]   ;;  %v2837_v56 = vld [vmem:[%s4005_s3 + $0x24c] ss:$16 sps:$4 sm:$0xff]   ;;  %v2832_v57 = vld [vmem:[%s4005_s3 + $0x240] ss:$16 sps:$4 sm:$0xff]  }
  0x25   : > { %v2835_v58 = vld [vmem:[%s4005_s3 + $0x248] ss:$16 sps:$4 sm:$0xff]   ;;  %v2838_v59 = vld [vmem:[%s4005_s3 + $0x220] ss:$16 sps:$4 sm:$0xff]   ;;  %v2840_v60 = vld [vmem:[%s4005_s3 + $0x224] ss:$16 sps:$4 sm:$0xff]  }
  0x26   : > { %1083 = vmatpush1.bf16.msra.mxu1 %v2808_v31  ;;  %v2841_v61 = vld [vmem:[%s4005_s3 + $0x228] ss:$16 sps:$4 sm:$0xff]   ;;  %v2843_v62 = vld [vmem:[%s4005_s3 + $0x22c] ss:$16 sps:$4 sm:$0xff]   ;;  %v2846_v63 = vld [vmem:[%s4005_s3 + $0x204] ss:$16 sps:$4 sm:$0xff]  }
  0x27   : > { %1084 = vmatprep.subr.bf16.mxu1 %v2816_v34  ;;  %473 = vmatpush1.bf16.msra.mxu0 %v2795_v32  ;;  %v2849_v0 = vld [vmem:[%s4005_s3 + $0x20c] ss:$16 sps:$4 sm:$0xff]   ;;  %v2844_v1 = vld [vmem:[%s4005_s3 + $0x200] ss:$16 sps:$4 sm:$0xff]   ;;  %v2847_v2 = vld [vmem:[%s4005_s3 + $0x208] ss:$16 sps:$4 sm:$0xff]  }
  0x28   : > { %474 = vmatprep.subr.bf16.mxu0 %v2800_v35  ;;  %v2852_v3 = vld [vmem:[%s4005_s3 + $0x3e4] ss:$16 sps:$4 sm:$0xff]   ;;  %v2855_v4 = vld [vmem:[%s4005_s3 + $0x3ec] ss:$16 sps:$4 sm:$0xff]   ;;  %v2850_v5 = vld [vmem:[%s4005_s3 + $0x3e0] ss:$16 sps:$4 sm:$0xff]  }
  0x29   : > { %v2853_v6 = vld [vmem:[%s4005_s3 + $0x3e8] ss:$16 sps:$4 sm:$0xff]   ;;  %vm528_vm4 = vsmask.f32 256  ;;  %vm531_vm6 = vsmask.f32 4352 }
  0x2a   : > { %1085 = vmatpush1.bf16.msra.mxu1 %v2814_v37  ;;  %vm3413_vm7 = vmand %vm527_vm3, %vm528_vm4  ;;  %v534_v9 = vld [vmem:[#allocation2 + $0x8] sm:$0x11]  ;;  %vm537_vm9 = vsmask.f32 7938  ;;  %vm539_vm10 = vsmask.f32 7954 }
  0x2b   : > { %1086 = vmatprep.subr.bf16.mxu1 %v2822_v39  ;;  %475 = vmatpush1.bf16.msra.mxu0 %v2798_v36  ;;  %vm3418_vm8 = vmand %vm530_vm5, %vm531_vm6  ;;  %v542_v10 = vld [vmem:[#allocation2] sm:$0x11]  ;;  %v2859_v14 = vld [vmem:[%s4005_s3 + $0x3c8] ss:$16 sps:$4 sm:$0xff]   ;;  %s3155_s11 = smov 32   ;;  %s3157_s26 = smov 64  }
  0x2c   : > { %1123 = vmatprep.subr.bf16.mxu0 %v2807_v41  ;;  %vm533_vm11 = vmor %vm3418_vm8, %vm3413_vm7  ;;  %v2856_v11 = vld [vmem:[%s4005_s3 + $0x3c0] ss:$16 sps:$4 sm:$0xff]   ;;  %v2858_v13 = vld [vmem:[%s4005_s3 + $0x3c4] ss:$16 sps:$4 sm:$0xff]   ;;  %s3092_s13 = scalar_lea.vmem %s2298_s8, 16  ;;  %s3098_s22 = scalar_lea.vmem %s3097_s16, 32 }
  0x2d   : > { %v535_v12 = vsel %vm533_vm11, 0, %v534_v9  ;;  %vm538_vm12 = vmand %vm527_vm3, %vm537_vm9  ;;  %v2861_v15 = vld [vmem:[%s4005_s3 + $0x3cc] ss:$16 sps:$4 sm:$0xff]   ;;  %v2864_v16 = vld [vmem:[%s4005_s3 + $0x3a4] ss:$16 sps:$4 sm:$0xff]   ;;  %p3093_p11 = scmp.ne.s32.totalorder %s2298_s8, %s3092_s13  ;;  %p3100_p1 = scmp.lt.s32.totalorder %s3098_s22, %s3092_s13 }
  0x2e   : > { %1087 = vmatpush1.bf16.msra.mxu1 %v2820_v42  ;;  %2392 = vmatmul.mubr.msk.bf16.vlgmr.msra.gmra.mxu0 %vm290_vm0, %v426_v45  ;;  %536 = vst [vmem:[#allocation2 + $0x8] sm:$0x11] %v535_v12  ;;  %vm540_vm13 = vmand %vm530_vm5, %vm539_vm10  ;;  %v2867_v17 = vld [vmem:[%s4005_s3 + $0x3ac] ss:$16 sps:$4 sm:$0xff]   ;;  %v2862_v19 = vld [vmem:[%s4005_s3 + $0x3a0] ss:$16 sps:$4 sm:$0xff]   ;;  %v509_v45 = vlaneseq }
  0x2f   : > { %1124 = vmatpush1.bf16.msra.mxu0 %v2805_v43  ;;  %1088 = vmatprep.subr.bf16.mxu1 %v2828_v51  ;;  %vm541_vm14 = vmor %vm540_vm13, %vm538_vm12  ;;  %v2865_v20 = vld [vmem:[%s4005_s3 + $0x3a8] ss:$16 sps:$4 sm:$0xff]   ;;  %vm579_vm0 = vcmask 1047556   ;;  %v2870_v22 = vld [vmem:[%s4005_s3 + $0x384] ss:$16 sps:$4 sm:$0xff]   ;;  %p3094_p12 = pnand %p3093_p11, %p3229_p5  ;;  %p3101_p2 = por %p3100_p1, %p3099_p0 }
  0x30   : > { %1125 = vmatprep.subr.bf16.mxu0 %v2813_v44  ;;  %v543_v18 = vsel %vm541_vm14, 0, %v542_v10  ;;  %vm3460_vm3 = vmand %vm577_vm15, %vm537_vm9  ;;  %v2873_v23 = vld [vmem:[%s4005_s3 + $0x38c] ss:$16 sps:$4 sm:$0xff]   ;;  %v2868_v25 = vld [vmem:[%s4005_s3 + $0x380] ss:$16 sps:$4 sm:$0xff]  }
  0x31   : > { %544 = vst [vmem:[#allocation2] sm:$0x11] %v543_v18  ;;  %vm3471_vm5 = vmand %vm579_vm0, %vm539_vm10  ;;  %v2871_v26 = vld [vmem:[%s4005_s3 + $0x388] ss:$16 sps:$4 sm:$0xff]   ;;  %v2876_v27 = vld [vmem:[%s4005_s3 + $0x364] ss:$16 sps:$4 sm:$0xff]   ;;  %p3095_p13 = pneg %p3094_p12 }
  0x32   : > { %1089 = vmatpush1.bf16.msra.mxu1 %v2826_v53  ;;  %vm581_vm6 = vmor %vm3471_vm5, %vm3460_vm3  ;;  %v2879_v28 = vld [vmem:[%s4005_s3 + $0x36c] ss:$16 sps:$4 sm:$0xff]   ;;  %v2874_v29 = vld [vmem:[%s4005_s3 + $0x360] ss:$16 sps:$4 sm:$0xff]   ;;  %vm555_vm9 = vsmask.f32 4368 }
  0x33   : > { %1126 = vmatpush1.bf16.msra.mxu0 %v2811_v46  ;;  %1090 = vmatprep.subr.bf16.mxu1 %v2834_v55  ;;  %v2877_v30 = vld [vmem:[%s4005_s3 + $0x368] ss:$16 sps:$4 sm:$0xff]   ;;  %v2882_v31 = vld [vmem:[%s4005_s3 + $0x344] ss:$16 sps:$4 sm:$0xff]   ;;  %v2885_v32 = vld [vmem:[%s4005_s3 + $0x34c] ss:$16 sps:$4 sm:$0xff]   ;;  %p3102_p3 = pnand %p3101_p2, %p3095_p13 }
  0x34   : > { %1127 = vmatprep.subr.bf16.mxu0 %v2819_v47  ;;  %v2880_v33 = vld [vmem:[%s4005_s3 + $0x340] ss:$16 sps:$4 sm:$0xff]   ;;  %v2883_v34 = vld [vmem:[%s4005_s3 + $0x348] ss:$16 sps:$4 sm:$0xff]   ;;  %v2888_v35 = vld [vmem:[%s4005_s3 + $0x324] ss:$16 sps:$4 sm:$0xff]  }
  0x35   : > { %v2891_v36 = vld [vmem:[%s4005_s3 + $0x32c] ss:$16 sps:$4 sm:$0xff]   ;;  %v2886_v37 = vld [vmem:[%s4005_s3 + $0x320] ss:$16 sps:$4 sm:$0xff]   ;;  %v2889_v38 = vld [vmem:[%s4005_s3 + $0x328] ss:$16 sps:$4 sm:$0xff]  }
  0x36   : > { %1091 = vmatpush1.bf16.msra.mxu1 %v2832_v57  ;;  %v2894_v39 = vld [vmem:[%s4005_s3 + $0x304] ss:$16 sps:$4 sm:$0xff]   ;;  %v2897_v40 = vld [vmem:[%s4005_s3 + $0x30c] ss:$16 sps:$4 sm:$0xff]   ;;  %v2892_v41 = vld [vmem:[%s4005_s3 + $0x300] ss:$16 sps:$4 sm:$0xff]  }
  0x37   : > { %1128 = vmatpush1.bf16.msra.mxu0 %v2817_v48  ;;  %1092 = vmatprep.subr.bf16.mxu1 %v2840_v60  ;;  %v2895_v42 = vld [vmem:[%s4005_s3 + $0x308] ss:$16 sps:$4 sm:$0xff]   ;;  %v2901_v43 = vld [vmem:[%s4005_s3 + $0xe4] ss:$16 sps:$4 sm:$0xff]   ;;  %v2904_v44 = vld [vmem:[%s4005_s3 + $0xec] ss:$16 sps:$4 sm:$0xff]  }
  0x38   : > { %1129 = vmatprep.subr.bf16.mxu0 %v2825_v49  ;;  %v3539_v49 = vshrl.u32 %v509_v45, 7  ;;  %v507_v53 = vld [vmem:[%s4004_s2] sm:$0x3]  ;;  %vm556_vm10 = vmor %vm528_vm4, %vm555_vm9 }
  0x3a   : > { %1093 = vmatpush1.bf16.msra.mxu1 %v2838_v59 }
  0x3b   : > { %1130 = vmatpush1.bf16.msra.mxu0 %v2823_v50  ;;  %1094 = vmatprep.subr.bf16.mxu1 %v2846_v63 }
  0x3c   : > { %1131 = vmatprep.subr.bf16.mxu0 %v2831_v52  ;;  %v511_v52 = vsub.s32 0, %v3539_v49 }
  0x3e   : > { %1095 = vmatpush1.bf16.msra.mxu1 %v2844_v1 }
  0x3f   : > { %1132 = vmatpush1.bf16.msra.mxu0 %v2829_v54  ;;  %1096 = vmatprep.subr.bf16.mxu1 %v2852_v3  ;;  %v515_v54 = vsub.s32 1, %v3539_v49 }
  0x40   : > { %1133 = vmatprep.subr.bf16.mxu0 %v2837_v56 }
  0x42   : > { %1097 = vmatpush2.bf16.msra.mxu1 %v2850_v5 }
  0x43   : > { %1134 = vmatpush1.bf16.msra.mxu0 %v2835_v58  ;;  %1098 = vmatprep.subr.bf16.mxu1 %v2858_v13  ;;  %v512_v58 = vrot.slane %v507_v53, %v511_v52 }
  0x44   : > { %1135 = vmatprep.subr.bf16.mxu0 %v2843_v62  ;;  %v516_v62 = vrot.slane %v507_v53, %v515_v54 }
  0x46   : > { %1099 = vmatpush2.bf16.msra.mxu1 %v2856_v11 }
  0x47   : > { %1136 = vmatpush1.bf16.msra.mxu0 %v2841_v61  ;;  %1100 = vmatprep.subr.bf16.mxu1 %v2864_v16 }
  0x48   : > { %1137 = vmatprep.subr.bf16.mxu0 %v2849_v0 }
  0x4a   : > { %1101 = vmatpush2.bf16.msra.mxu1 %v2862_v19 }
  0x4b   : > { %1138 = vmatpush1.bf16.msra.mxu0 %v2847_v2  ;;  %1102 = vmatprep.subr.bf16.mxu1 %v2870_v22 }
  0x4c   : > { %1139 = vmatprep.subr.bf16.mxu0 %v2855_v4 }
  0x4e   : > { %1103 = vmatpush2.bf16.msra.mxu1 %v2868_v25  ;;  %v582_v25 = vld [vmem:[#allocation2 + $0x8] sm:$0xff] }
  0x4f   : > { %1140 = vmatpush2.bf16.msra.mxu0 %v2853_v6  ;;  %1104 = vmatprep.subr.bf16.mxu1 %v2876_v27 }
  0x50   : > { %1141 = vmatprep.subr.bf16.mxu0 %v2861_v15 }
  0x52   : > { %1105 = vmatpush2.bf16.msra.mxu1 %v2874_v29 }
  0x53   : > { %1142 = vmatpush2.bf16.msra.mxu0 %v2859_v14  ;;  %1106 = vmatprep.subr.bf16.mxu1 %v2882_v31  ;;  %v586_v31 = vld [vmem:[#allocation2] sm:$0x11] }
  0x54   : > { %1143 = vmatprep.subr.bf16.mxu0 %v2867_v17 }
  0x56   : > { %1107 = vmatpush2.bf16.msra.mxu1 %v2880_v33 }
  0x57   : > { %1144 = vmatpush2.bf16.msra.mxu0 %v2865_v20  ;;  %1108 = vmatprep.subr.bf16.mxu1 %v2888_v35 }
  0x58   : > { %1145 = vmatprep.subr.bf16.mxu0 %v2873_v23 }
  0x5a   : > { %1109 = vmatpush2.bf16.msra.mxu1 %v2886_v37 }
  0x5b   : > { %1146 = vmatpush2.bf16.msra.mxu0 %v2871_v26  ;;  %1110 = vmatprep.subr.bf16.mxu1 %v2894_v39 }
  0x5c   : > { %1147 = vmatprep.subr.bf16.mxu0 %v2879_v28 }
  0x5e   : > { %1111 = vmatpush2.bf16.msra.mxu1 %v2892_v41 }
  0x5f   : > { %1148 = vmatpush2.bf16.msra.mxu0 %v2877_v30  ;;  %1488 = vmatprep.subr.bf16.mxu1 %v2901_v43 }
  0x60   : > { %1149 = vmatprep.subr.bf16.mxu0 %v2885_v32 }
  0x63   : > { %1150 = vmatpush2.bf16.msra.mxu0 %v2883_v34 }
  0x64   : > { %1151 = vmatprep.subr.bf16.mxu0 %v2891_v36 }
  0x67   : > { %1152 = vmatpush2.bf16.msra.mxu0 %v2889_v38 }
  0x68   : > { %1153 = vmatprep.subr.bf16.mxu0 %v2897_v40 }
  0x6b   : > { %1154 = vmatpush2.bf16.msra.mxu0 %v2895_v42 }
  0x6c   : > { %1531 = vmatprep.subr.bf16.mxu0 %v2904_v44 }
  0xe1   : > { %v403_v47 = vpop.f32.mrf.mxu1 }
  0xe2   : > { %v328_v46 = vpop.f32.mrf.mxu0 }
  0xe3   : > { %v405_v50 = vpop.f32.mrf.mxu1  ;;  %v404_v57 = vadd.f32 %v403_v47, %v328_v46 }
  0xe4   : > { %v330_v48 = vpop.f32.mrf.mxu0 }
  0xe5   : > { %v407_v55 = vpop.f32.mrf.mxu1  ;;  %v406_v60 = vadd.f32 %v405_v50, %v330_v48 }
  0xe6   : > { %v332_v51 = vpop.f32.mrf.mxu0 }
  0xe7   : > { %v409_v63 = vpop.f32.mrf.mxu1  ;;  %v408_v1 = vadd.f32 %v407_v55, %v332_v51 }
  0xe8   : > { %v334_v56 = vpop.f32.mrf.mxu0 }
  0xe9   : > { %v410_v5 = vadd.f32 %v409_v63, %v334_v56  ;;  %v2902_v63 = vld [vmem:[%s4005_s3 + $0xe8] ss:$16 sps:$4 sm:$0xff]  }
  0xee   : > { %v494_v59 = vpop.f32.mrf.mxu0 }
  0xef   : > { %v503_v61 = vadd.f32 %v494_v59, %v404_v57 }
  0xf0   : > { %v496_v0 = vpop.f32.mrf.mxu0 }
  0xf1   : > { %v519_v2 = vadd.f32 %v512_v58, %v503_v61  ;;  %v504_v3 = vadd.f32 %v496_v0, %v406_v60 }
  0xf2   : > { %v498_v4 = vpop.f32.mrf.mxu0 }
  0xf3   : > { %v520_v6 = vadd.f32 %v516_v62, %v504_v3  ;;  %v505_v9 = vadd.f32 %v498_v4, %v408_v1  ;;  %v523_v11 = vmax.f32 %v519_v2, 0.0  ;;  %v2908_v2 = vld [vmem:[%s4005_s3 + $0xc4] ss:$16 sps:$4 sm:$0xff]   ;;  %v2911_v3 = vld [vmem:[%s4005_s3 + $0xcc] ss:$16 sps:$4 sm:$0xff]  }
  0xf4   : > { %v500_v10 = vpop.f32.mrf.mxu0  ;;  %v2906_v4 = vld [vmem:[%s4005_s3 + $0xc0] ss:$16 sps:$4 sm:$0xff]  }
  0xf5   : > { %v524_v12 = vmax.f32 %v520_v6, 0.0  ;;  %v521_v13 = vadd.f32 %v512_v58, %v505_v9  ;;  %v506_v14 = vadd.f32 %v500_v10, %v410_v5  ;;  %v2909_v5 = vld [vmem:[%s4005_s3 + $0xc8] ss:$16 sps:$4 sm:$0xff]   ;;  %v2914_v6 = vld [vmem:[%s4005_s3 + $0xa4] ss:$16 sps:$4 sm:$0xff]  }
  0xf6   : > { %v2917_v9 = vld [vmem:[%s4005_s3 + $0xac] ss:$16 sps:$4 sm:$0xff]   ;;  %v2912_v10 = vld [vmem:[%s4005_s3 + $0xa0] ss:$16 sps:$4 sm:$0xff]  }
  0xf7   : > { %v2724_v15 = vpack.c.bf16 %v524_v12, %v523_v11  ;;  %v522_v16 = vadd.f32 %v516_v62, %v506_v14  ;;  %v525_v18 = vmax.f32 %v521_v13, 0.0  ;;  %v2899_v62 = vld [vmem:[%s4005_s3 + $0xe0] ss:$16 sps:$4 sm:$0xff]   ;;  %v2915_v11 = vld [vmem:[%s4005_s3 + $0xa8] ss:$16 sps:$4 sm:$0xff]  }
  0xf8   : > { %v2920_v12 = vld [vmem:[%s4005_s3 + $0x84] ss:$16 sps:$4 sm:$0xff]   ;;  %v2923_v13 = vld [vmem:[%s4005_s3 + $0x8c] ss:$16 sps:$4 sm:$0xff]   ;;  %v2918_v14 = vld [vmem:[%s4005_s3 + $0x80] ss:$16 sps:$4 sm:$0xff]  }
  0xf9   : > { %v558_v17 = vshrl.u32 %v2724_v15, 16  ;;  %v526_v19 = vmax.f32 %v522_v16, 0.0  ;;  %v561_v22 = vshll.u32 %v2724_v15, 16  ;;  %v2921_v15 = vld [vmem:[%s4005_s3 + $0x88] ss:$16 sps:$4 sm:$0xff]  }
  0xfa   : > { %v2926_v16 = vld [vmem:[%s4005_s3 + $0x64] ss:$16 sps:$4 sm:$0xff]  }
  0xfb   : > { %v560_v20 = vrot.slane %v558_v17, 7  ;;  %v2725_v23 = vpack.c.bf16 %v526_v19, %v525_v18  ;;  %v2929_v17 = vld [vmem:[%s4005_s3 + $0x6c] ss:$16 sps:$4 sm:$0xff]   ;;  %v2924_v18 = vld [vmem:[%s4005_s3 + $0x60] ss:$16 sps:$4 sm:$0xff]  }
  0xfc   : > { %v2927_v19 = vld [vmem:[%s4005_s3 + $0x68] ss:$16 sps:$4 sm:$0xff]  }
  0xfd   : > { %v563_v26 = vor.u32 %v561_v22, %v560_v20  ;;  %v566_v27 = vshrl.u32 %v2725_v23, 16  ;;  %v569_v30 = vshll.u32 %v2725_v23, 16  ;;  %v564_v32 = vrot.slane %v560_v20, 4  ;;  %v2932_v20 = vld [vmem:[%s4005_s3 + $0x44] ss:$16 sps:$4 sm:$0xff]  }
  0xfe   : > { %v2935_v22 = vld [vmem:[%s4005_s3 + $0x4c] ss:$16 sps:$4 sm:$0xff]   ;;  %v2930_v23 = vld [vmem:[%s4005_s3 + $0x40] ss:$16 sps:$4 sm:$0xff]  }
  0xff   : > { %v583_v28 = vsel %vm581_vm6, %v563_v26, %v582_v25  ;;  %v568_v29 = vrot.slane %v566_v27, 7  ;;  %v2933_v25 = vld [vmem:[%s4005_s3 + $0x48] ss:$16 sps:$4 sm:$0xff]   ;;  %v2938_v26 = vld [vmem:[%s4005_s3 + $0x24] ss:$16 sps:$4 sm:$0xff]  }
 0x100   : > { %584 = vst [vmem:[#allocation2 + $0x8] sm:$0xff] %v583_v28  ;;  %v2941_v27 = vld [vmem:[%s4005_s3 + $0x2c] ss:$16 sps:$4 sm:$0xff]  }
 0x101   : > { %v571_v33 = vor.u32 %v569_v30, %v568_v29  ;;  %v573_v34 = vrot.slane %v568_v29, 4  ;;  %v2939_v29 = vld [vmem:[%s4005_s3 + $0x28] ss:$16 sps:$4 sm:$0xff]   ;;  %v2944_v30 = vld [vmem:[%s4005_s3 + $0x4] ss:$16 sps:$4 sm:$0xff]  }
 0x103   : > { %v572_v35 = vsel %vm556_vm10, %v564_v32, %v571_v33  ;;  %v587_v24 = vsel %vm533_vm11, %v573_v34, %v586_v31  ;;  %v2947_v31 = vld [vmem:[%s4005_s3 + $0xc] ss:$16 sps:$4 sm:$0xff]   ;;  %v2942_v32 = vld [vmem:[%s4005_s3] ss:$16 sps:$4 sm:$0xff]   ;;  %v2945_v33 = vld [vmem:[%s4005_s3 + $0x8] ss:$16 sps:$4 sm:$0xff]  }
 0x104   : > { %588 = vst [vmem:[#allocation2] sm:$0x11] %v587_v24  ;;  %v2460_v21 = vcombine.high %v583_v28, %v572_v35  ;;  %v3561_v36 = vcombine.low %v583_v28, %v572_v35  ;;  %v2936_v28 = vld [vmem:[%s4005_s3 + $0x20] ss:$16 sps:$4 sm:$0xff]   ;;  %v2950_v34 = vld [vmem:[%s4005_s3 + $0x1e4] ss:$16 sps:$4 sm:$0xff]  }
 0x105   : > { %v2948_v24 = vld [vmem:[%s4005_s3 + $0x1e0] ss:$16 sps:$4 sm:$0xff]  }
 0x106   : > { %v749_v37 = vshll.u32 %v2460_v21, 16  ;;  %v737_v38 = vshll.u32 %v3561_v36, 16  ;;  %v747_v8 = vshrl.u32 %v2460_v21, 16  ;;  %v735_v7 = vshrl.u32 %v3561_v36, 16 }
 0x107   : > { %v1574_v39 = vld [vmem:[#allocation2 + $0x8] sm:$0xee] }
 0x108   : > { %v2656_v40 = vcombine.high %v1574_v39, %v572_v35  ;;  %v2655_v41 = vcombine.low %v1574_v39, %v572_v35  ;;  %v751_v43 = vrot.slane %v749_v37, 1  ;;  %v739_v44 = vrot.slane %v737_v38, 1  ;;  %v2953_v35 = vld [vmem:[%s4005_s3 + $0x1ec] ss:$16 sps:$4 sm:$0xff]   ;;  %v2956_v37 = vld [vmem:[%s4005_s3 + $0x1c4] ss:$16 sps:$4 sm:$0xff]  }
 0x109   : > { %v2959_v38 = vld [vmem:[%s4005_s3 + $0x1cc] ss:$16 sps:$4 sm:$0xff]   ;;  %v2954_v39 = vld [vmem:[%s4005_s3 + $0x1c0] ss:$16 sps:$4 sm:$0xff]  }
 0x10a   : > { %v1648_v47 = vrot.slane %v2656_v40, 1  ;;  %v1645_v48 = vrot.slane %v2655_v41, 1  ;;  %v752_v56 = vor.u32 %v751_v43, %v747_v8  ;;  %v740_v57 = vor.u32 %v739_v44, %v735_v7  ;;  %v2957_v40 = vld [vmem:[%s4005_s3 + $0x1c8] ss:$16 sps:$4 sm:$0xff]   ;;  %v2962_v41 = vld [vmem:[%s4005_s3 + $0x1a4] ss:$16 sps:$4 sm:$0xff]  }
 0x10b   : > { %v655_v42 = vld [vmem:[#allocation2] sm:$0x11]  ;;  %v2963_v44 = vld [vmem:[%s4005_s3 + $0x1a8] ss:$16 sps:$4 sm:$0xff]  }
 0x10c   : > { %v2462_v45 = vcombine.high %v655_v42, %v655_v42  ;;  %v2461_v46 = vcombine.low %v655_v42, %v655_v42  ;;  %v2965_v42 = vld [vmem:[%s4005_s3 + $0x1ac] ss:$16 sps:$4 sm:$0xff]   ;;  %v2960_v43 = vld [vmem:[%s4005_s3 + $0x1a0] ss:$16 sps:$4 sm:$0xff]   ;;  %v2969_v7 = vld [vmem:[%s4005_s3 + $0x188] ss:$16 sps:$4 sm:$0xff]  }
 0x10d   : > { %v2966_v8 = vld [vmem:[%s4005_s3 + $0x180] ss:$16 sps:$4 sm:$0xff]  }
 0x10e   : > { %v754_v50 = vshll.u32 %v2462_v45, 16  ;;  %v742_v51 = vshll.u32 %v2461_v46, 16  ;;  %v1649_v53 = vrot.slane %v2462_v45, 1  ;;  %v1646_v55 = vrot.slane %v2461_v46, 1  ;;  %v2968_v45 = vld [vmem:[%s4005_s3 + $0x184] ss:$16 sps:$4 sm:$0xff]  }
 0x10f   : > { %v2971_v46 = vld [vmem:[%s4005_s3 + $0x18c] ss:$16 sps:$4 sm:$0xff]  }
 0x110   : > { %v756_v58 = vrot.slane %v754_v50, 1  ;;  %v744_v59 = vrot.slane %v742_v51, 1  ;;  %v3566_v60 = vsel %vm423_vm2, %v1648_v47, %v1649_v53  ;;  %v3569_v61 = vsel %vm423_vm2, %v1645_v48, %v1646_v55  ;;  %v2974_v47 = vld [vmem:[%s4005_s3 + $0x164] ss:$16 sps:$4 sm:$0xff]   ;;  %v2977_v48 = vld [vmem:[%s4005_s3 + $0x16c] ss:$16 sps:$4 sm:$0xff]  }
 0x111   : > { %v2972_v50 = vld [vmem:[%s4005_s3 + $0x160] ss:$16 sps:$4 sm:$0xff]   ;;  %v2975_v51 = vld [vmem:[%s4005_s3 + $0x168] ss:$16 sps:$4 sm:$0xff]   ;;  %v2980_v53 = vld [vmem:[%s4005_s3 + $0x144] ss:$16 sps:$4 sm:$0xff]  }
 0x112   : > { %v757_v0 = vsel %vm247_vm1, %v752_v56, %v756_v58  ;;  %v745_v1 = vsel %vm247_vm1, %v740_v57, %v744_v59  ;;  %v2983_v55 = vld [vmem:[%s4005_s3 + $0x14c] ss:$16 sps:$4 sm:$0xff]   ;;  %v2978_v56 = vld [vmem:[%s4005_s3 + $0x140] ss:$16 sps:$4 sm:$0xff]   ;;  %v2981_v57 = vld [vmem:[%s4005_s3 + $0x148] ss:$16 sps:$4 sm:$0xff]  }
 0x113   : > { %1112 = vmatprep.mubr.bf16.mxu1 %v757_v0  ;;  %1155 = vmatprep.mubr.bf16.mxu0 %v757_v0  ;;  %v2986_v58 = vld [vmem:[%s4005_s3 + $0x124] ss:$16 sps:$4 sm:$0xff]   ;;  %v2989_v59 = vld [vmem:[%s4005_s3 + $0x12c] ss:$16 sps:$4 sm:$0xff]   ;;  %vm2271_vm1 = vcmask 261120   ;;  %vm2282_vm2 = vcmask 253952  }
 0x114   : > { %1113 = vmatmul.mubr.bf16.vlgmr.msra.gmra.mxu1 %v745_v1  ;;  %1156 = vmatmul.mubr.bf16.vlgmr.msra.gmra.mxu0 %v745_v1  ;;  %v2992_v0 = vld [vmem:[%s4005_s3 + $0x104] ss:$16 sps:$4 sm:$0xff]   ;;  %v2995_v1 = vld [vmem:[%s4005_s3 + $0x10c] ss:$16 sps:$4 sm:$0xff]  }
 0x115   : > { %1489 = vmatpush1.bf16.msra.mxu1 %v2899_v62  ;;  %1532 = vmatpush1.bf16.msra.mxu0 %v2902_v63  ;;  %v2984_v62 = vld [vmem:[%s4005_s3 + $0x120] ss:$16 sps:$4 sm:$0xff]   ;;  %v2987_v63 = vld [vmem:[%s4005_s3 + $0x128] ss:$16 sps:$4 sm:$0xff]  }
 0x116   : > { %1520 = vmatprep.mubr.bf16.mxu1 %v2460_v21  ;;  %1563 = vmatprep.mubr.bf16.mxu0 %v2460_v21  ;;  %v2951_v21 = vld [vmem:[%s4005_s3 + $0x1e8] ss:$16 sps:$4 sm:$0xff]  }
 0x117   : > { %1490 = vmatprep.subr.bf16.mxu1 %v2908_v2  ;;  %1533 = vmatprep.subr.bf16.mxu0 %v2911_v3  ;;  %v2990_v2 = vld [vmem:[%s4005_s3 + $0x100] ss:$16 sps:$4 sm:$0xff]   ;;  %v2993_v3 = vld [vmem:[%s4005_s3 + $0x108] ss:$16 sps:$4 sm:$0xff]  }
 0x119   : > { %1491 = vmatpush1.bf16.msra.mxu1 %v2906_v4  ;;  %1534 = vmatpush1.bf16.msra.mxu0 %v2909_v5  ;;  %v2998_v4 = vld [vmem:[%s4005_s3 + $0x4e4] ss:$16 sps:$4 sm:$0xff]   ;;  %v3001_v5 = vld [vmem:[%s4005_s3 + $0x4ec] ss:$16 sps:$4 sm:$0xff]  }
 0x11a   : > { %1492 = vmatprep.subr.bf16.mxu1 %v2914_v6  ;;  %1535 = vmatprep.subr.bf16.mxu0 %v2917_v9  ;;  %v2996_v6 = vld [vmem:[%s4005_s3 + $0x4e0] ss:$16 sps:$4 sm:$0xff]   ;;  %v2999_v9 = vld [vmem:[%s4005_s3 + $0x4e8] ss:$16 sps:$4 sm:$0xff]  }
 0x11d   : > { %1493 = vmatpush1.bf16.msra.mxu1 %v2912_v10  ;;  %1536 = vmatpush1.bf16.msra.mxu0 %v2915_v11  ;;  %v3004_v10 = vld [vmem:[%s4005_s3 + $0x4c4] ss:$16 sps:$4 sm:$0xff]   ;;  %v3007_v11 = vld [vmem:[%s4005_s3 + $0x4cc] ss:$16 sps:$4 sm:$0xff]  }
 0x11e   : > { %1494 = vmatprep.subr.bf16.mxu1 %v2920_v12  ;;  %1537 = vmatprep.subr.bf16.mxu0 %v2923_v13  ;;  %v3002_v12 = vld [vmem:[%s4005_s3 + $0x4c0] ss:$16 sps:$4 sm:$0xff]   ;;  %v3005_v13 = vld [vmem:[%s4005_s3 + $0x4c8] ss:$16 sps:$4 sm:$0xff]  }
 0x121   : > { %1495 = vmatpush1.bf16.msra.mxu1 %v2918_v14  ;;  %1538 = vmatpush1.bf16.msra.mxu0 %v2921_v15  ;;  %v3010_v14 = vld [vmem:[%s4005_s3 + $0x4a4] ss:$16 sps:$4 sm:$0xff]   ;;  %v3008_v15 = vld [vmem:[%s4005_s3 + $0x4a0] ss:$16 sps:$4 sm:$0xff]  }
 0x122   : > { %1496 = vmatprep.subr.bf16.mxu1 %v2926_v16  ;;  %1539 = vmatprep.subr.bf16.mxu0 %v2929_v17  ;;  %v3016_v16 = vld [vmem:[%s4005_s3 + $0x484] ss:$16 sps:$4 sm:$0xff]   ;;  %v3019_v17 = vld [vmem:[%s4005_s3 + $0x48c] ss:$16 sps:$4 sm:$0xff]  }
 0x125   : > { %1497 = vmatpush1.bf16.msra.mxu1 %v2924_v18  ;;  %1540 = vmatpush1.bf16.msra.mxu0 %v2927_v19  ;;  %v3014_v18 = vld [vmem:[%s4005_s3 + $0x480] ss:$16 sps:$4 sm:$0xff]   ;;  %v3017_v19 = vld [vmem:[%s4005_s3 + $0x488] ss:$16 sps:$4 sm:$0xff]  }
 0x126   : > { %1498 = vmatprep.subr.bf16.mxu1 %v2932_v20  ;;  %1541 = vmatprep.subr.bf16.mxu0 %v2935_v22  ;;  %v3022_v20 = vld [vmem:[%s4005_s3 + $0x464] ss:$16 sps:$4 sm:$0xff]   ;;  %v3025_v22 = vld [vmem:[%s4005_s3 + $0x46c] ss:$16 sps:$4 sm:$0xff]  }
 0x129   : > { %1499 = vmatpush1.bf16.msra.mxu1 %v2930_v23  ;;  %1542 = vmatpush1.bf16.msra.mxu0 %v2933_v25  ;;  %v3020_v23 = vld [vmem:[%s4005_s3 + $0x460] ss:$16 sps:$4 sm:$0xff]   ;;  %v3023_v25 = vld [vmem:[%s4005_s3 + $0x468] ss:$16 sps:$4 sm:$0xff]  }
 0x12a   : > { %1500 = vmatprep.subr.bf16.mxu1 %v2938_v26  ;;  %1543 = vmatprep.subr.bf16.mxu0 %v2941_v27  ;;  %v3028_v26 = vld [vmem:[%s4005_s3 + $0x444] ss:$16 sps:$4 sm:$0xff]   ;;  %v3031_v27 = vld [vmem:[%s4005_s3 + $0x44c] ss:$16 sps:$4 sm:$0xff]  }
 0x12d   : > { %1501 = vmatpush1.bf16.msra.mxu1 %v2936_v28  ;;  %1544 = vmatpush1.bf16.msra.mxu0 %v2939_v29  ;;  %v3026_v28 = vld [vmem:[%s4005_s3 + $0x440] ss:$16 sps:$4 sm:$0xff]   ;;  %v3029_v29 = vld [vmem:[%s4005_s3 + $0x448] ss:$16 sps:$4 sm:$0xff]  }
 0x12e   : > { %1502 = vmatprep.subr.bf16.mxu1 %v2944_v30  ;;  %1545 = vmatprep.subr.bf16.mxu0 %v2947_v31  ;;  %v3034_v30 = vld [vmem:[%s4005_s3 + $0x424] ss:$16 sps:$4 sm:$0xff]   ;;  %v3037_v31 = vld [vmem:[%s4005_s3 + $0x42c] ss:$16 sps:$4 sm:$0xff]  }
 0x131   : > { %1503 = vmatpush1.bf16.msra.mxu1 %v2942_v32  ;;  %1546 = vmatpush1.bf16.msra.mxu0 %v2945_v33  ;;  %v3032_v32 = vld [vmem:[%s4005_s3 + $0x420] ss:$16 sps:$4 sm:$0xff]   ;;  %v3035_v33 = vld [vmem:[%s4005_s3 + $0x428] ss:$16 sps:$4 sm:$0xff]  }
 0x132   : > { %1504 = vmatprep.subr.bf16.mxu1 %v2950_v34  ;;  %1547 = vmatprep.subr.bf16.mxu0 %v2953_v35  ;;  %v3040_v34 = vld [vmem:[%s4005_s3 + $0x404] ss:$16 sps:$4 sm:$0xff]   ;;  %v3043_v35 = vld [vmem:[%s4005_s3 + $0x40c] ss:$16 sps:$4 sm:$0xff]  }
 0x135   : > { %1505 = vmatpush2.bf16.msra.mxu1 %v2948_v24  ;;  %1548 = vmatpush2.bf16.msra.mxu0 %v2951_v21  ;;  %v3038_v24 = vld [vmem:[%s4005_s3 + $0x400] ss:$16 sps:$4 sm:$0xff]   ;;  %v3041_v21 = vld [vmem:[%s4005_s3 + $0x408] ss:$16 sps:$4 sm:$0xff]  }
 0x136   : > { %1506 = vmatprep.subr.bf16.mxu1 %v2956_v37  ;;  %1549 = vmatprep.subr.bf16.mxu0 %v2959_v38  ;;  %v3046_v37 = vld [vmem:[%s4005_s3 + $0x5e4] ss:$16 sps:$4 sm:$0xff]   ;;  %v3049_v38 = vld [vmem:[%s4005_s3 + $0x5ec] ss:$16 sps:$4 sm:$0xff]  }
 0x139   : > { %1507 = vmatpush2.bf16.msra.mxu1 %v2954_v39  ;;  %1550 = vmatpush2.bf16.msra.mxu0 %v2957_v40  ;;  %v3044_v39 = vld [vmem:[%s4005_s3 + $0x5e0] ss:$16 sps:$4 sm:$0xff]   ;;  %v3047_v40 = vld [vmem:[%s4005_s3 + $0x5e8] ss:$16 sps:$4 sm:$0xff]  }
 0x13a   : > { %1508 = vmatprep.subr.bf16.mxu1 %v2962_v41  ;;  %1551 = vmatprep.subr.bf16.mxu0 %v2965_v42  ;;  %v3052_v41 = vld [vmem:[%s4005_s3 + $0x5c4] ss:$16 sps:$4 sm:$0xff]   ;;  %v3055_v42 = vld [vmem:[%s4005_s3 + $0x5cc] ss:$16 sps:$4 sm:$0xff]  }
 0x13d   : > { %1509 = vmatpush2.bf16.msra.mxu1 %v2960_v43  ;;  %1552 = vmatpush2.bf16.msra.mxu0 %v2963_v44  ;;  %v3050_v43 = vld [vmem:[%s4005_s3 + $0x5c0] ss:$16 sps:$4 sm:$0xff]   ;;  %v3053_v44 = vld [vmem:[%s4005_s3 + $0x5c8] ss:$16 sps:$4 sm:$0xff]  }
 0x13e   : > { %1510 = vmatprep.subr.bf16.mxu1 %v2968_v45  ;;  %1553 = vmatprep.subr.bf16.mxu0 %v2971_v46  ;;  %v3058_v45 = vld [vmem:[%s4005_s3 + $0x5a4] ss:$16 sps:$4 sm:$0xff]   ;;  %v3061_v46 = vld [vmem:[%s4005_s3 + $0x5ac] ss:$16 sps:$4 sm:$0xff]  }
 0x141   : > { %1511 = vmatpush2.bf16.msra.mxu1 %v2966_v8  ;;  %1554 = vmatpush2.bf16.msra.mxu0 %v2969_v7  ;;  %v3056_v8 = vld [vmem:[%s4005_s3 + $0x5a0] ss:$16 sps:$4 sm:$0xff]   ;;  %v3059_v7 = vld [vmem:[%s4005_s3 + $0x5a8] ss:$16 sps:$4 sm:$0xff]  }
 0x142   : > { %1512 = vmatprep.subr.bf16.mxu1 %v2974_v47  ;;  %1555 = vmatprep.subr.bf16.mxu0 %v2977_v48  ;;  %v3064_v47 = vld [vmem:[%s4005_s3 + $0x584] ss:$16 sps:$4 sm:$0xff]   ;;  %v3067_v48 = vld [vmem:[%s4005_s3 + $0x58c] ss:$16 sps:$4 sm:$0xff]  }
 0x145   : > { %1513 = vmatpush2.bf16.msra.mxu1 %v2972_v50  ;;  %1556 = vmatpush2.bf16.msra.mxu0 %v2975_v51  ;;  %v3062_v50 = vld [vmem:[%s4005_s3 + $0x580] ss:$16 sps:$4 sm:$0xff]   ;;  %v3065_v51 = vld [vmem:[%s4005_s3 + $0x588] ss:$16 sps:$4 sm:$0xff]  }
 0x146   : > { %1514 = vmatprep.subr.bf16.mxu1 %v2980_v53  ;;  %1557 = vmatprep.subr.bf16.mxu0 %v2983_v55  ;;  %v3070_v53 = vld [vmem:[%s4005_s3 + $0x564] ss:$16 sps:$4 sm:$0xff]   ;;  %v3073_v55 = vld [vmem:[%s4005_s3 + $0x56c] ss:$16 sps:$4 sm:$0xff]  }
 0x149   : > { %1515 = vmatpush2.bf16.msra.mxu1 %v2978_v56  ;;  %1558 = vmatpush2.bf16.msra.mxu0 %v2981_v57  ;;  %v3068_v56 = vld [vmem:[%s4005_s3 + $0x560] ss:$16 sps:$4 sm:$0xff]   ;;  %v3071_v57 = vld [vmem:[%s4005_s3 + $0x568] ss:$16 sps:$4 sm:$0xff]  }
 0x14a   : > { %1516 = vmatprep.subr.bf16.mxu1 %v2986_v58  ;;  %1559 = vmatprep.subr.bf16.mxu0 %v2989_v59  ;;  %v3076_v58 = vld [vmem:[%s4005_s3 + $0x544] ss:$16 sps:$4 sm:$0xff]   ;;  %v3079_v59 = vld [vmem:[%s4005_s3 + $0x54c] ss:$16 sps:$4 sm:$0xff]  }
 0x14d   : > { %1517 = vmatpush2.bf16.msra.mxu1 %v2984_v62  ;;  %1560 = vmatpush2.bf16.msra.mxu0 %v2987_v63  ;;  %v3074_v62 = vld [vmem:[%s4005_s3 + $0x540] ss:$16 sps:$4 sm:$0xff]   ;;  %v3077_v63 = vld [vmem:[%s4005_s3 + $0x548] ss:$16 sps:$4 sm:$0xff]  }
 0x14e   : > { %1518 = vmatprep.subr.bf16.mxu1 %v2992_v0  ;;  %1561 = vmatprep.subr.bf16.mxu0 %v2995_v1  ;;  %v3082_v0 = vld [vmem:[%s4005_s3 + $0x524] ss:$16 sps:$4 sm:$0xff]   ;;  %v3085_v1 = vld [vmem:[%s4005_s3 + $0x52c] ss:$16 sps:$4 sm:$0xff]  }
 0x151   : > { %1519 = vmatpush2.bf16.msra.mxu1 %v2990_v2  ;;  %1562 = vmatpush2.bf16.msra.mxu0 %v2993_v3  ;;  %v3080_v2 = vld [vmem:[%s4005_s3 + $0x520] ss:$16 sps:$4 sm:$0xff]   ;;  %v3083_v3 = vld [vmem:[%s4005_s3 + $0x528] ss:$16 sps:$4 sm:$0xff]  }
 0x152   : > { %1973 = vmatprep.subr.bf16.mxu1 %v2998_v4  ;;  %2016 = vmatprep.subr.bf16.mxu0 %v3001_v5  ;;  %v3088_v4 = vld [vmem:[%s4005_s3 + $0x504] ss:$16 sps:$4 sm:$0xff]   ;;  %v3091_v5 = vld [vmem:[%s4005_s3 + $0x50c] ss:$16 sps:$4 sm:$0xff]  }
 0x154   : > { %1521 = vmatmul.mubr.bf16.vlgmr.msra.gmra.mxu1 %v3561_v36  ;;  %1564 = vmatmul.mubr.bf16.vlgmr.msra.gmra.mxu0 %v3561_v36  ;;  %v3013_v36 = vld [vmem:[%s4005_s3 + $0x4ac] ss:$16 sps:$4 sm:$0xff]  }
 0x155   : > { %1974 = vmatpush1.bf16.msra.mxu1 %v2996_v6  ;;  %2005 = vmatprep.mubr.bf16.mxu1 %v3566_v60  ;;  %v3086_v6 = vld [vmem:[%s4005_s3 + $0x500] ss:$16 sps:$4 sm:$0xff]  }
 0x156   : > { %2017 = vmatpush1.bf16.msra.mxu0 %v2999_v9  ;;  %2048 = vmatprep.mubr.bf16.mxu0 %v3566_v60  ;;  %v3011_v60 = vld [vmem:[%s4005_s3 + $0x4a8] ss:$16 sps:$4 sm:$0xff]  }
 0x157   : > { %1975 = vmatprep.subr.bf16.mxu1 %v3004_v10  ;;  %2018 = vmatprep.subr.bf16.mxu0 %v3007_v11  ;;  %v3089_v9 = vld [vmem:[%s4005_s3 + $0x508] ss:$16 sps:$4 sm:$0xff]  }
 0x159   : > { %1976 = vmatpush1.bf16.msra.mxu1 %v3002_v12 }
 0x15a   : > { %2019 = vmatpush1.bf16.msra.mxu0 %v3005_v13  ;;  %1977 = vmatprep.subr.bf16.mxu1 %v3010_v14 }
 0x15b   : > { %2020 = vmatprep.subr.bf16.mxu0 %v3013_v36 }
 0x15d   : > { %1978 = vmatpush1.bf16.msra.mxu1 %v3008_v15 }
 0x15e   : > { %2021 = vmatpush1.bf16.msra.mxu0 %v3011_v60  ;;  %1979 = vmatprep.subr.bf16.mxu1 %v3016_v16 }
 0x15f   : > { %2022 = vmatprep.subr.bf16.mxu0 %v3019_v17 }
 0x161   : > { %1980 = vmatpush1.bf16.msra.mxu1 %v3014_v18 }
 0x162   : > { %2023 = vmatpush1.bf16.msra.mxu0 %v3017_v19  ;;  %1981 = vmatprep.subr.bf16.mxu1 %v3022_v20 }
 0x163   : > { %2024 = vmatprep.subr.bf16.mxu0 %v3025_v22 }
 0x165   : > { %1982 = vmatpush1.bf16.msra.mxu1 %v3020_v23 }
 0x166   : > { %2025 = vmatpush1.bf16.msra.mxu0 %v3023_v25  ;;  %1983 = vmatprep.subr.bf16.mxu1 %v3028_v26  ;;  %v2067_v25 = vld [vmem:[%s4006_s4] sm:$0xf] }
 0x167   : > { %2026 = vmatprep.subr.bf16.mxu0 %v3031_v27 }
 0x169   : > { %1984 = vmatpush1.bf16.msra.mxu1 %v3026_v28 }
 0x16a   : > { %2027 = vmatpush1.bf16.msra.mxu0 %v3029_v29  ;;  %1985 = vmatprep.subr.bf16.mxu1 %v3034_v30  ;;  %v2083_v30 = vsub.s32 3, %v3539_v49 }
 0x16b   : > { %2028 = vmatprep.subr.bf16.mxu0 %v3037_v31 }
 0x16d   : > { %1986 = vmatpush1.bf16.msra.mxu1 %v3032_v32 }
 0x16e   : > { %2029 = vmatpush1.bf16.msra.mxu0 %v3035_v33  ;;  %1987 = vmatprep.subr.bf16.mxu1 %v3040_v34  ;;  %v2072_v33 = vrot.slane %v2067_v25, %v511_v52 }
 0x16f   : > { %2030 = vmatprep.subr.bf16.mxu0 %v3043_v35 }
 0x171   : > { %1988 = vmatpush1.bf16.msra.mxu1 %v3038_v24 }
 0x172   : > { %2031 = vmatpush1.bf16.msra.mxu0 %v3041_v21  ;;  %1989 = vmatprep.subr.bf16.mxu1 %v3046_v37 }
 0x173   : > { %2032 = vmatprep.subr.bf16.mxu0 %v3049_v38 }
 0x175   : > { %1990 = vmatpush2.bf16.msra.mxu1 %v3044_v39 }
 0x176   : > { %2033 = vmatpush2.bf16.msra.mxu0 %v3047_v40  ;;  %1991 = vmatprep.subr.bf16.mxu1 %v3052_v41  ;;  %v2076_v40 = vrot.slane %v2067_v25, %v515_v54 }
 0x177   : > { %2034 = vmatprep.subr.bf16.mxu0 %v3055_v42 }
 0x179   : > { %1992 = vmatpush2.bf16.msra.mxu1 %v3050_v43  ;;  %v2084_v43 = vrot.slane %v2067_v25, %v2083_v30 }
 0x17a   : > { %2035 = vmatpush2.bf16.msra.mxu0 %v3053_v44  ;;  %1993 = vmatprep.subr.bf16.mxu1 %v3058_v45 }
 0x17b   : > { %2036 = vmatprep.subr.bf16.mxu0 %v3061_v46 }
 0x17d   : > { %1994 = vmatpush2.bf16.msra.mxu1 %v3056_v8 }
 0x17e   : > { %2037 = vmatpush2.bf16.msra.mxu0 %v3059_v7  ;;  %1995 = vmatprep.subr.bf16.mxu1 %v3064_v47 }
 0x17f   : > { %2038 = vmatprep.subr.bf16.mxu0 %v3067_v48 }
 0x181   : > { %1996 = vmatpush2.bf16.msra.mxu1 %v3062_v50 }
 0x182   : > { %2039 = vmatpush2.bf16.msra.mxu0 %v3065_v51  ;;  %1997 = vmatprep.subr.bf16.mxu1 %v3070_v53 }
 0x183   : > { %2040 = vmatprep.subr.bf16.mxu0 %v3073_v55 }
 0x185   : > { %1998 = vmatpush2.bf16.msra.mxu1 %v3068_v56 }
 0x186   : > { %2041 = vmatpush2.bf16.msra.mxu0 %v3071_v57  ;;  %1999 = vmatprep.subr.bf16.mxu1 %v3076_v58 }
 0x187   : > { %2042 = vmatprep.subr.bf16.mxu0 %v3079_v59 }
 0x189   : > { %2000 = vmatpush2.bf16.msra.mxu1 %v3074_v62 }
 0x18a   : > { %2043 = vmatpush2.bf16.msra.mxu0 %v3077_v63  ;;  %2001 = vmatprep.subr.bf16.mxu1 %v3082_v0 }
 0x18b   : > { %2044 = vmatprep.subr.bf16.mxu0 %v3085_v1 }
 0x18d   : > { %2002 = vmatpush2.bf16.msra.mxu1 %v3080_v2 }
 0x18e   : > { %2045 = vmatpush2.bf16.msra.mxu0 %v3083_v3  ;;  %2003 = vmatprep.subr.bf16.mxu1 %v3088_v4 }
 0x18f   : > { %2046 = vmatprep.subr.bf16.mxu0 %v3091_v5 }
 0x191   : > { %2004 = vmatpush2.bf16.msra.mxu1 %v3086_v6 }
 0x192   : > { %2047 = vmatpush2.bf16.msra.mxu0 %v3089_v9 }
 0x194   : > { %2006 = vmatmul.mubr.bf16.vlgmr.msra.gmra.mxu1 %v3569_v61 }
 0x195   : > { %2049 = vmatmul.mubr.bf16.vlgmr.msra.gmra.mxu0 %v3569_v61  ;;  %v2079_v61 = vsub.s32 2, %v3539_v49 }
 0x197   : > { %v2080_v24 = vrot.slane %v2067_v25, %v2079_v61 }
 0x1d4   : > { %v1114_v10 = vpop.f32.mrf.mxu1  ;;  %v1157_v11 = vpop.f32.mrf.mxu0 }
 0x1d6   : > { %v1116_v12 = vpop.f32.mrf.mxu1  ;;  %v1159_v13 = vpop.f32.mrf.mxu0 }
 0x1d8   : > { %v1118_v14 = vpop.f32.mrf.mxu1  ;;  %v1161_v36 = vpop.f32.mrf.mxu0 }
 0x1da   : > { %v1120_v15 = vpop.f32.mrf.mxu1  ;;  %v1163_v60 = vpop.f32.mrf.mxu0 }
 0x214   : > { %v1522_v16 = vpop.f32.mrf.mxu1  ;;  %v1565_v17 = vpop.f32.mrf.mxu0 }
 0x215   : > { %v1523_v26 = vadd.f32 %v1522_v16, %v1114_v10  ;;  %v1566_v28 = vadd.f32 %v1565_v17, %v1157_v11 }
 0x216   : > { %v1524_v18 = vpop.f32.mrf.mxu1  ;;  %v1567_v19 = vpop.f32.mrf.mxu0 }
 0x217   : > { %v1525_v31 = vadd.f32 %v1524_v18, %v1116_v12  ;;  %v1568_v37 = vadd.f32 %v1567_v19, %v1159_v13 }
 0x218   : > { %v1526_v20 = vpop.f32.mrf.mxu1  ;;  %v1569_v22 = vpop.f32.mrf.mxu0 }
 0x219   : > { %v1527_v38 = vadd.f32 %v1526_v20, %v1118_v14  ;;  %v1570_v42 = vadd.f32 %v1569_v22, %v1161_v36 }
 0x21a   : > { %v1528_v23 = vpop.f32.mrf.mxu1  ;;  %v1571_v27 = vpop.f32.mrf.mxu0 }
 0x21b   : > { %v1529_v45 = vadd.f32 %v1528_v23, %v1120_v15  ;;  %v1572_v52 = vadd.f32 %v1571_v27, %v1163_v60 }
 0x254   : > { %v2007_v29 = vpop.f32.mrf.mxu1 }
 0x255   : > { %v2059_v32 = vadd.f32 %v2007_v29, %v1523_v26  ;;  %v2050_v34 = vpop.f32.mrf.mxu0 }
 0x256   : > { %v2061_v35 = vadd.f32 %v2050_v34, %v1566_v28  ;;  %v2009_v21 = vpop.f32.mrf.mxu1 }
 0x257   : > { %v2060_v39 = vadd.f32 %v2009_v21, %v1525_v31  ;;  %v2052_v41 = vpop.f32.mrf.mxu0  ;;  %v2089_v46 = vadd.f32 %v2072_v33, %v2059_v32 }
 0x258   : > { %v2011_v44 = vpop.f32.mrf.mxu1  ;;  %v2062_v8 = vadd.f32 %v2052_v41, %v1568_v37  ;;  %v2091_v48 = vadd.f32 %v2080_v24, %v2061_v35 }
 0x259   : > { %v2063_v7 = vadd.f32 %v2011_v44, %v1527_v38  ;;  %v2054_v47 = vpop.f32.mrf.mxu0  ;;  %v2090_v53 = vadd.f32 %v2076_v40, %v2060_v39  ;;  %v2097_v54 = vmax.f32 %v2089_v46, 0.0 }
 0x25a   : > { %v2065_v50 = vadd.f32 %v2054_v47, %v1570_v42  ;;  %v2013_v51 = vpop.f32.mrf.mxu1  ;;  %v2092_v62 = vadd.f32 %v2084_v43, %v2062_v8  ;;  %v2099_v1 = vmax.f32 %v2091_v48, 0.0 }
 0x25b   : > { %v2093_v55 = vadd.f32 %v2072_v33, %v2063_v7  ;;  %v2064_v56 = vadd.f32 %v2013_v51, %v1529_v45  ;;  %v2056_v57 = vpop.f32.mrf.mxu0  ;;  %v2098_v4 = vmax.f32 %v2090_v53, 0.0  ;;  %v3159_v45 = vmov 1934713408  }
 0x25c   : > { %v2095_v58 = vadd.f32 %v2080_v24, %v2065_v50  ;;  %v2066_v59 = vadd.f32 %v2056_v57, %v1572_v52  ;;  %v2100_v11 = vmax.f32 %v2092_v62, 0.0  ;;  %v2207_v46 = vunpack.c.l.s4 %v3159_v45 }
 0x25d   : > { %v2101_v63 = vmax.f32 %v2093_v55, 0.0  ;;  %v2094_v0 = vadd.f32 %v2076_v40, %v2064_v56  ;;  %v3158_v40 = vmov 1983009808  }
 0x25e   : > { %v2103_v2 = vmax.f32 %v2095_v58, 0.0  ;;  %v2096_v3 = vadd.f32 %v2084_v43, %v2066_v59  ;;  %v2175_v41 = vunpack.c.l.s4 %v3158_v40  ;;  %v2208_v55 = vunpack.c.0.s8 %v2207_v46 }
 0x25f   : > { %v2105_v5 = vadd.f32 %v2101_v63, %v2097_v54  ;;  %v2102_v6 = vmax.f32 %v2094_v0, 0.0 }
 0x260   : > { %v2119_v9 = vadd.f32 %v2103_v2, %v2099_v1  ;;  %v2104_v10 = vmax.f32 %v2096_v3, 0.0  ;;  %v2176_v44 = vunpack.c.0.s8 %v2175_v41  ;;  %v2211_v2 = vsub.s32 %v2208_v55, %v3539_v49 }
 0x261   : > { %v2106_v12 = vrot.slane %v2105_v5, 4  ;;  %v2112_v13 = vadd.f32 %v2102_v6, %v2098_v4 }
 0x262   : > { %v2120_v14 = vrot.slane %v2119_v9, 4  ;;  %v2126_v60 = vadd.f32 %v2104_v10, %v2100_v11  ;;  %v2179_v52 = vsub.s32 %v2176_v44, %v3539_v49 }
 0x263   : > { %v2107_v36 = vadd.f32 %v2106_v12, %v2105_v5  ;;  %v2113_v15 = vrot.slane %v2112_v13, 4 }
 0x264   : > { %v2121_v16 = vadd.f32 %v2120_v14, %v2119_v9  ;;  %v2127_v23 = vrot.slane %v2126_v60, 4 }
 0x265   : > { %v2108_v17 = vrot.slane %v2107_v36, 2  ;;  %v2114_v18 = vadd.f32 %v2113_v15, %v2112_v13 }
 0x266   : > { %v2122_v19 = vrot.slane %v2121_v16, 2  ;;  %v2128_v27 = vadd.f32 %v2127_v23, %v2126_v60 }
 0x267   : > { %v2109_v20 = vadd.f32 %v2108_v17, %v2107_v36  ;;  %v2115_v22 = vrot.slane %v2114_v18, 2 }
 0x268   : > { %v2123_v25 = vadd.f32 %v2122_v19, %v2121_v16  ;;  %v2129_v30 = vrot.slane %v2128_v27, 2 }
 0x269   : > { %v2110_v61 = vrot.slane %v2109_v20, 1  ;;  %v2116_v26 = vadd.f32 %v2115_v22, %v2114_v18 }
 0x26a   : > { %v2124_v29 = vrot.slane %v2123_v25, 1  ;;  %v2130_v33 = vadd.f32 %v2129_v30, %v2128_v27 }
 0x26b   : > { %v2111_v28 = vadd.f32 %v2110_v61, %v2109_v20  ;;  %v2117_v32 = vrot.slane %v2116_v26, 1 }
 0x26c   : > { %v2125_v31 = vadd.f32 %v2124_v29, %v2123_v25  ;;  %v2131_v35 = vrot.slane %v2130_v33, 1 }
 0x26d   : > { %2140 = vrot.lane.b32.xlu1 %v2111_v28, %s3155_s11  ;;  %2134 = vrot.lane.b32.xlu0 %v2111_v28, %s3156_s25  ;;  %v2118_v34 = vadd.f32 %v2117_v32, %v2116_v26 }
 0x26e   : > { %v2132_v24 = vadd.f32 %v2131_v35, %v2130_v33 }
 0x271   : > { %2157 = vrot.lane.b32.xlu1 %v2125_v31, %s3157_s26  ;;  %2137 = vrot.lane.b32.xlu0 %v2111_v28, %s3157_s26 }
 0x275   : > { %2144 = vrot.lane.b32.xlu1 %v2118_v34, %s3156_s25  ;;  %2154 = vrot.lane.b32.xlu0 %v2125_v31, %s3156_s25 }
 0x279   : > { %2150 = vrot.lane.b32.xlu1 %v2118_v34, %s3155_s11  ;;  %2160 = vrot.lane.b32.xlu0 %v2125_v31, %s3155_s11 }
 0x27d   : > { %2164 = vrot.lane.b32.xlu1 %v2132_v24, %s3156_s25  ;;  %2147 = vrot.lane.b32.xlu0 %v2118_v34, %s3157_s26 }
 0x281   : > { %2170 = vrot.lane.b32.xlu1 %v2132_v24, %s3155_s11  ;;  %2167 = vrot.lane.b32.xlu0 %v2132_v24, %s3157_s26 }
 0x2df   : > { %v2141_v21 = vpop.permute.xlu1 %2140  ;;  %v2135_v37 = vpop.permute.xlu0 %2134 }
 0x2e0   : > { %v2181_v48 = vcombine.low %v2135_v37, %v2141_v21 }
 0x2e2   : > { %v2188_v54 = vrot.slane %v2181_v48, %v2179_v52 }
 0x2e3   : > { %v2158_v38 = vpop.permute.xlu1 %2157  ;;  %v2138_v39 = vpop.permute.xlu0 %2137 }
 0x2e4   : > { %v2173_v47 = vcombine.low %v2111_v28, %v2138_v39  ;;  %v2222_v53 = vcombine.low %v2125_v31, %v2158_v38 }
 0x2e6   : > { %v2180_v58 = vrot.slane %v2173_v47, %v2179_v52  ;;  %v2229_v1 = vrot.slane %v2222_v53, %v2179_v52 }
 0x2e7   : > { %v2145_v42 = vpop.permute.xlu1 %2144  ;;  %v2155_v43 = vpop.permute.xlu0 %2154 }
 0x2e8   : > { %v2205_v5 = vcombine.low %v2180_v58, %v2188_v54 }
 0x2ea   : > { %v2212_v36 = vrot.slane %v2205_v5, %v2211_v2 }
 0x2eb   : > { %v2151_v8 = vpop.permute.xlu1 %2150  ;;  %v2161_v7 = vpop.permute.xlu0 %2160 }
 0x2ec   : > { %v2197_v50 = vcombine.low %v2145_v42, %v2151_v8  ;;  %v2230_v51 = vcombine.low %v2155_v43, %v2161_v7 }
 0x2ee   : > { %v2204_v62 = vrot.slane %v2197_v50, %v2179_v52  ;;  %v2237_v63 = vrot.slane %v2230_v51, %v2179_v52 }
 0x2ef   : > { %v2165_v56 = vpop.permute.xlu1 %2164  ;;  %v2148_v57 = vpop.permute.xlu0 %2147 }
 0x2f0   : > { %v2189_v59 = vcombine.low %v2118_v34, %v2148_v57  ;;  %v2254_v11 = vcombine.low %v2229_v1, %v2237_v63 }
 0x2f2   : > { %v2196_v0 = vrot.slane %v2189_v59, %v2179_v52  ;;  %v2261_v60 = vrot.slane %v2254_v11, %v2211_v2 }
 0x2f3   : > { %v2171_v3 = vpop.permute.xlu1 %2170  ;;  %v2168_v4 = vpop.permute.xlu0 %2167 }
 0x2f4   : > { %v2213_v6 = vcombine.low %v2196_v0, %v2204_v62  ;;  %v2246_v9 = vcombine.low %v2165_v56, %v2171_v3  ;;  %v2238_v10 = vcombine.low %v2132_v24, %v2168_v4 }
 0x2f6   : > { %v2220_v12 = vrot.slane %v2213_v6, %v2211_v2  ;;  %v2253_v13 = vrot.slane %v2246_v9, %v2179_v52  ;;  %v2245_v14 = vrot.slane %v2238_v10, %v2179_v52 }
 0x2f8   : > { %v2262_v15 = vcombine.low %v2245_v14, %v2253_v13  ;;  %v2221_v16 = vcombine.low %v2212_v36, %v2220_v12 }
 0x2fa   : > { %v2269_v17 = vrot.slane %v2262_v15, %v2211_v2  ;;  %v2272_v49 = vsel %vm2271_vm1, %v2221_v16, 0.0 }
 0x2fc   : > { %v2270_v18 = vcombine.low %v2261_v60, %v2269_v17 }
 0x2fe   : > { %v2273_v19 = vsel %vm2271_vm1, %v2270_v18, 0.0 }
 0x2ff   : > { %v2274_v20 = vadd.f32 %v2273_v19, %v2272_v49 }
 0x301   : > { %v2275_v22 = vrot.slane %v2274_v20, 4 }
 0x303   : > { %v2276_v23 = vadd.f32 %v2275_v22, %v2274_v20 }
 0x305   : > { %v2277_v25 = vrot.slane %v2276_v23, 2 }
 0x307   : > { %v2278_v61 = vadd.f32 %v2277_v25, %v2276_v23 }
 0x309   : > { %v2279_v26 = vrot.slane %v2278_v61, 1 }
 0x30b   : > { %v2280_v27 = vadd.f32 %v2279_v26, %v2278_v61 }
 0x30d   : > { %v2281_v28 = vmul.f32 0.00390625, %v2280_v27 }
 0x30f   : > { %2283 = vst.msk [vmem:[%s216_s7] sm:$0x1] %vm2282_vm2, %v2281_v28 }
 0x310   : > { %3105 = shalt.err (!%p3102_p3)
}
 0x311   : > { %s3106_s17 = scalar_lea.hbm %s2295_s12, 16  ;;  %s3110_s25 = scalar_lea.hbm %s4007_s5, 32 }
 0x312   : > { %p3107_p4 = scmp.ne.s32.totalorder %s2295_s12, %s3106_s17  ;;  %p3111_p9 = scmp.lt.s32.totalorder %s2295_s12, %s4007_s5 }
 0x313   : > { %p3112_p10 = scmp.lt.s32.totalorder %s3110_s25, %s3106_s17 }
 0x314   : > { %p3108_p7 = pnand %p3107_p4, %p3229_p5 }
 0x315   : > { %p3113_p11 = por %p3112_p10, %p3111_p9 }
 0x316   : > { %p3109_p8 = pneg %p3108_p7 }
 0x318   : > { %p3114_p12 = pnand %p3113_p11, %p3109_p8 }
 0x31a   : > { %3117 = shalt.err (!%p3114_p12)
}
 0x31b   : > { %2727 = dma.vmem_to_hbm [thread:$0]  (%p3229_p5), %s2298_s8, 16, %s2295_s12, %s2285_s14  }
 0x31c PF: > { %p2733_p13 = scmp.ge.s32.totalorder %s3152_s21, 2  ;;  %s2309_s6 = sand.u32 1, %s3140_s18  }
 0x31d   : > { %s2310_s7 = scalar_lea.sflag [#allocation4], %s2309_s6 }
 0x31e   : > { %p2730_p0 = pnand %p2733_p13, %p3233_p6 }
 0x320   : > { %p2731_p1 = pneg %p2730_p0 }
 0x322   : > { %3135 = dma.done.wait (%p2731_p1), %s2310_s7, 16  }
 0x323   : > { %3137 = vsyncadd (%p2731_p1), %s2310_s7, 4294967280  ;;  %p15_p2 = scmp.ge.s32.totalorder %s3216_s24, 4   ;;  %s4018_s18 = smov %s3144_s19 }
 0x324   : > { %s4019_s19 = smov %s3148_s20  ;;  %s4020_s20 = smov %s3227_s27 }
 0x325   : > { %s4021_s21 = smov %s3216_s24  ;;  %17 = sbr.rel (!%p15_p2) target bundleno = 3 (0x3), region = 79 }
 0x32a   :  { %2314 = vsyncpa [#allocation4], 1 }
 0x32b   :  { %2316 = vsyncpa [#allocation4 + $0x1], 1 }

</bundles_post_ra>
